<compile_context>
chip_gen: v6e
topology: v6e:2x2x1
jax: 0.10.0
libtpu: 0.0.40
codegen_flags: <defaults>
</compile_context>

<pallas_src>
import functools
import math

import jax
import jax.numpy as jnp
from jax.experimental import pallas as pl
from jax.experimental.pallas import tpu as pltpu


# Row indices of the packed (9, D) small-vector operand.
_BQ, _BK, _BV, _BO, _LN1_G, _LN1_B, _B2, _LN2_G, _LN2_B = range(9)


def _layer_norm(z, g, b, eps=1e-5):
    mu = jnp.mean(z, axis=-1, keepdims=True)
    var = jnp.mean((z - mu) ** 2, axis=-1, keepdims=True)
    return (z - mu) * jax.lax.rsqrt(var + eps) * g + b


def encoder_layer_kernel(
    x_full_ref,                       # (1, L, D)  full sequence (K/V source)
    x_q_ref,                          # (1, tq, D) query-row tile
    wq_ref, wk_ref, wv_ref, wo_ref,   # (D, D) bf16
    w1_ref, w2_ref,                   # (D, dff), (dff, D) bf16
    b1_ref,                           # (1, dff) f32
    vecs_ref,                         # (9, D)  f32 packed biases / LN params
    out_ref,                          # (1, tq, D)
    *rest,
    n_heads, with_attn,
):
    if with_attn:
        attn_ref, k_scr, v_scr, q_scr, ctx_scr = rest
    else:
        k_scr, v_scr, q_scr, ctx_scr = rest

    qi = pl.program_id(1)
    L = x_full_ref.shape[1]
    D = x_full_ref.shape[2]
    H = n_heads
    dh = D // H
    scale = 1.0 / math.sqrt(dh)

    # ---- K / V projections: once per batch element, stored head-major in
    #      VMEM scratch and reused by every query tile of this batch element.
    @pl.when(qi == 0)
    def _():
        x_full = x_full_ref[0].astype(jnp.bfloat16)                    # (L, D)
        k = jnp.dot(x_full, wk_ref[...],
                    preferred_element_type=jnp.float32) + vecs_ref[_BK]
        v = jnp.dot(x_full, wv_ref[...],
                    preferred_element_type=jnp.float32) + vecs_ref[_BV]
        for h in range(H):                 # static slice-stores (no transpose op)
            k_scr[h] = k[:, h * dh:(h + 1) * dh].astype(jnp.bfloat16)
            v_scr[h] = v[:, h * dh:(h + 1) * dh].astype(jnp.bfloat16)

    # ---- Q projection for this query tile; softmax scale folded into Q. ----
    x_q = x_q_ref[0].astype(jnp.float32)                               # (tq, D)
    q = (jnp.dot(x_q.astype(jnp.bfloat16), wq_ref[...],
                 preferred_element_type=jnp.float32) + vecs_ref[_BQ]) * scale
    for h in range(H):
        q_scr[h] = q[:, h * dh:(h + 1) * dh].astype(jnp.bfloat16)

    # ---- Head-batched attention: one dot_general for QK^T, one for PV. ----
    s = jnp.einsum("hqd,hkd->hqk", q_scr[...], k_scr[...],
                   preferred_element_type=jnp.float32)                 # (H, tq, L)
    m = jnp.max(s, axis=-1, keepdims=True)
    e = jnp.exp(s - m)
    p = e * pl.reciprocal(jnp.sum(e, axis=-1, keepdims=True), approx=True)
    if with_attn:
        attn_ref[0] = p.astype(attn_ref.dtype)

    ctx = jnp.einsum("hqk,hkd->hqd", p.astype(jnp.bfloat16), v_scr[...],
                     preferred_element_type=jnp.float32)               # (H, tq, dh)
    for h in range(H):                       # write heads straight into (tq, D)
        ctx_scr[:, h * dh:(h + 1) * dh] = ctx[h]

    attn_out = jnp.dot(ctx_scr[...].astype(jnp.bfloat16), wo_ref[...],
                       preferred_element_type=jnp.float32) + vecs_ref[_BO]

    # ---- residual + LayerNorm (dropout == identity in eval) ----
    x1 = _layer_norm(x_q + attn_out, vecs_ref[_LN1_G], vecs_ref[_LN1_B])

    # ---- MLPLayer: pointwise conv -> relu -> pointwise conv, residual + LN ----
    y = jnp.dot(x1.astype(jnp.bfloat16), w1_ref[...],
                preferred_element_type=jnp.float32) + b1_ref[0]
    y = jnp.maximum(y, 0.0)                                            # relu
    y = jnp.dot(y.astype(jnp.bfloat16), w2_ref[...],
                preferred_element_type=jnp.float32) + vecs_ref[_B2]
    out = _layer_norm(x1 + y, vecs_ref[_LN2_G], vecs_ref[_LN2_B])

    out_ref[0] = out.astype(out_ref.dtype)


def encoder_layer(x, params, n_heads, *, return_attn=True, q_tile=None):
    B, L, D = x.shape
    d_ff = params["w1"].shape[1]
    H = n_heads
    assert D % H == 0, "d_model must be divisible by n_heads"
    dh = D // H

    if q_tile is None:
        q_tile = 128 if (L % 128 == 0) else L
    assert L % q_tile == 0 and (q_tile == L or q_tile % 8 == 0)
    nq = L // q_tile

    # bf16 matmul operands (accumulation stays f32 inside the MXU).
    wq = params["wq"].astype(jnp.bfloat16)
    wk = params["wk"].astype(jnp.bfloat16)
    wv = params["wv"].astype(jnp.bfloat16)
    wo = params["wo"].astype(jnp.bfloat16)
    w1 = params["w1"].astype(jnp.bfloat16)
    w2 = params["w2"].astype(jnp.bfloat16)
    b1 = params["b1"].astype(jnp.float32)

    # Pack the 9 small per-feature vectors into one (9, D) operand.
    vecs = jnp.concatenate(
        [params["bq"], params["bk"], params["bv"], params["bo"],
         params["ln1_g"], params["ln1_b"], params["b2"],
         params["ln2_g"], params["ln2_b"]],
        axis=0).astype(jnp.float32)

    kernel = functools.partial(encoder_layer_kernel, n_heads=H,
                               with_attn=return_attn)

    def const_spec(shape):
        return pl.BlockSpec(shape, lambda b, t: (0,) * len(shape))

    in_specs = [
        pl.BlockSpec((1, L, D), lambda b, t: (b, 0, 0)),         # x (full, K/V)
        pl.BlockSpec((1, q_tile, D), lambda b, t: (b, t, 0)),    # x (query tile)
        const_spec((D, D)), const_spec((D, D)),                  # Wq, Wk
        const_spec((D, D)), const_spec((D, D)),                  # Wv, Wo
        const_spec((D, d_ff)), const_spec((d_ff, D)),            # W1, W2
        const_spec((1, d_ff)),                                   # b1
        const_spec((9, D)),                                      # packed vectors
    ]
    out_specs = [pl.BlockSpec((1, q_tile, D), lambda b, t: (b, t, 0))]
    out_shape = [jax.ShapeDtypeStruct((B, L, D), x.dtype)]
    if return_attn:
        out_specs.append(pl.BlockSpec((1, H, q_tile, L),
                                      lambda b, t: (b, 0, t, 0)))
        out_shape.append(jax.ShapeDtypeStruct((B, H, L, L), jnp.float32))

    scratch_shapes = [
        pltpu.VMEM((H, L, dh), jnp.bfloat16),       # K, head-major
        pltpu.VMEM((H, L, dh), jnp.bfloat16),       # V, head-major
        pltpu.VMEM((H, q_tile, dh), jnp.bfloat16),  # Q tile, head-major
        pltpu.VMEM((q_tile, D), jnp.float32),       # per-head context (concat-free)
    ]

    # Advisory cost estimate + scoped-VMEM sizing.
    flops = float(B) * (8.0 * L * D * D + 4.0 * L * L * D + 4.0 * L * D * d_ff)
    transcendentals = float(B * H * L * L)
    param_bytes = (4 * D * D + 2 * D * d_ff) * 2 + (9 * D + d_ff) * 4
    bytes_accessed = (2.0 * x.size * x.dtype.itemsize + param_bytes
                      + (B * H * L * L * 4 if return_attn else 0))

    in_block_bytes = (L * D * 4 + q_tile * D * 4
                      + (4 * D * D + 2 * D * d_ff) * 2 + d_ff * 4 + 16 * D * 4)
    out_block_bytes = q_tile * D * 4 + (H * q_tile * L * 4 if return_attn else 0)
    scratch_bytes = 2 * H * L * dh * 2 + H * q_tile * dh * 2 + q_tile * D * 4
    vmem_est = 2 * (in_block_bytes + out_block_bytes) + scratch_bytes + (4 << 20)
    vmem_limit = int(min(128 * 1024 * 1024, max(32 * 1024 * 1024, vmem_est)))

    result = pl.pallas_call(
        kernel,
        grid=(B, nq),
        in_specs=in_specs,
        out_specs=out_specs,
        out_shape=out_shape,
        scratch_shapes=scratch_shapes,
        compiler_params=pltpu.CompilerParams(
            dimension_semantics=("parallel", "arbitrary"),
            vmem_limit_bytes=vmem_limit,
        ),
        cost_estimate=pl.CostEstimate(
            flops=int(flops),
            transcendentals=int(transcendentals),
            bytes_accessed=int(bytes_accessed),
        ),
    )(x, x, wq, wk, wv, wo, w1, w2, b1, vecs)

    if return_attn:
        return result[0], result[1]
    return result[0], None


def init_params(key, d_model, d_ff):
    ks = jax.random.split(key, 8)
    s_qkv = 1.0 / (d_model ** 0.5)
    s_ff = 1.0 / (d_ff ** 0.5)
    return {
        "wq": jax.random.normal(ks[0], (d_model, d_model), jnp.float32) * s_qkv,
        "bq": jnp.zeros((1, d_model), jnp.float32),
        "wk": jax.random.normal(ks[1], (d_model, d_model), jnp.float32) * s_qkv,
        "bk": jnp.zeros((1, d_model), jnp.float32),
        "wv": jax.random.normal(ks[2], (d_model, d_model), jnp.float32) * s_qkv,
        "bv": jnp.zeros((1, d_model), jnp.float32),
        "wo": jax.random.normal(ks[3], (d_model, d_model), jnp.float32) * s_qkv,
        "bo": jax.random.normal(ks[4], (1, d_model), jnp.float32) * 0.01,
        "ln1_g": jnp.ones((1, d_model), jnp.float32),
        "ln1_b": jnp.zeros((1, d_model), jnp.float32),
        "w1": jax.random.normal(ks[5], (d_model, d_ff), jnp.float32) * s_qkv,
        "b1": jax.random.normal(ks[6], (1, d_ff), jnp.float32) * 0.01,
        "w2": jax.random.normal(ks[7], (d_ff, d_model), jnp.float32) * s_ff,
        "b2": jnp.zeros((1, d_model), jnp.float32),
        "ln2_g": jnp.ones((1, d_model), jnp.float32),
        "ln2_b": jnp.zeros((1, d_model), jnp.float32),
    }


if __name__ == "__main__":
    B, L, D, H = 2, 8, 32, 4
    d_ff = 4 * D  # default d_ff = 4 * d_model

    key = jax.random.PRNGKey(0)
    kx, kp = jax.random.split(key)
    x = jax.random.normal(kx, (B, L, D), jnp.float32)
    params = init_params(kp, D, d_ff)

    out, attn = encoder_layer(x, params, n_heads=H, return_attn=True)
    out = jax.block_until_ready(out)
    attn = jax.block_until_ready(attn)

    assert out.shape == (B, L, D)
    assert attn.shape == (B, H, L, L)
    assert bool(jnp.all(jnp.isfinite(out)))
    print("KERNEL_OK")
</pallas_src>

<mosaic_0001>
module attributes {stable_mosaic.version = 11 : i64} {
  func.func @encoder_layer_kernel(%arg0: i32, %arg1: i32, %arg2: memref<1x8x32xf32, #tpu.memory_space<vmem>>, %arg3: memref<1x8x32xf32, #tpu.memory_space<vmem>>, %arg4: memref<32x32xbf16, #tpu.memory_space<vmem>>, %arg5: memref<32x32xbf16, #tpu.memory_space<vmem>>, %arg6: memref<32x32xbf16, #tpu.memory_space<vmem>>, %arg7: memref<32x32xbf16, #tpu.memory_space<vmem>>, %arg8: memref<32x128xbf16, #tpu.memory_space<vmem>>, %arg9: memref<128x32xbf16, #tpu.memory_space<vmem>>, %arg10: memref<1x128xf32, #tpu.memory_space<vmem>>, %arg11: memref<9x32xf32, #tpu.memory_space<vmem>>, %arg12: memref<1x8x32xf32, #tpu.memory_space<vmem>>, %arg13: memref<1x4x8x8xf32, #tpu.memory_space<vmem>>, %arg14: memref<4x8x8xbf16, #tpu.memory_space<vmem>>, %arg15: memref<4x8x8xbf16, #tpu.memory_space<vmem>>, %arg16: memref<4x8x8xbf16, #tpu.memory_space<vmem>>, %arg17: memref<8x32xf32, #tpu.memory_space<vmem>>) attributes {dimension_semantics = [#tpu.dimension_semantics<parallel>, #tpu.dimension_semantics<arbitrary>], iteration_bounds = array<i64: 2, 1>, scalar_prefetch = 0 : i64, scratch_operands = 4 : i64, tpu.core_type = #tpu.core_type<tc>, window_params = [{transform_indices = @transform_0, window_bounds = array<i64: 1, 8, 32>}, {transform_indices = @transform_1, window_bounds = array<i64: 1, 8, 32>}, {pipeline_mode = #tpu.pipeline_mode<synchronous>, transform_indices = @transform_2, window_bounds = array<i64: 32, 32>}, {pipeline_mode = #tpu.pipeline_mode<synchronous>, transform_indices = @transform_3, window_bounds = array<i64: 32, 32>}, {pipeline_mode = #tpu.pipeline_mode<synchronous>, transform_indices = @transform_4, window_bounds = array<i64: 32, 32>}, {pipeline_mode = #tpu.pipeline_mode<synchronous>, transform_indices = @transform_5, window_bounds = array<i64: 32, 32>}, {pipeline_mode = #tpu.pipeline_mode<synchronous>, transform_indices = @transform_6, window_bounds = array<i64: 32, 128>}, {pipeline_mode = #tpu.pipeline_mode<synchronous>, transform_indices = @transform_7, window_bounds = array<i64: 128, 32>}, {pipeline_mode = #tpu.pipeline_mode<synchronous>, transform_indices = @transform_8, window_bounds = array<i64: 1, 128>}, {pipeline_mode = #tpu.pipeline_mode<synchronous>, transform_indices = @transform_9, window_bounds = array<i64: 9, 32>}, {transform_indices = @transform_10, window_bounds = array<i64: 1, 8, 32>}, {transform_indices = @transform_11, window_bounds = array<i64: 1, 4, 8, 8>}]} {
    %c0_i32 = arith.constant 0 : i32
    %0 = arith.cmpi eq, %arg1, %c0_i32 : i32
    %1 = arith.extui %0 : i1 to i32
    %c0_i32_0 = arith.constant 0 : i32
    %2 = arith.cmpi ne, %1, %c0_i32_0 : i32
    scf.if %2 {
      %c0_74 = arith.constant 0 : index
      %c0_75 = arith.constant 0 : index
      %c0_76 = arith.constant 0 : index
      %154 = vector.load %arg2[%c0_74, %c0_75, %c0_76] : memref<1x8x32xf32, #tpu.memory_space<vmem>>, vector<1x8x32xf32>
      %155 = vector.shape_cast %154 : vector<1x8x32xf32> to vector<8x32xf32>
      %156 = arith.truncf %155 : vector<8x32xf32> to vector<8x32xbf16>
      %c0_77 = arith.constant 0 : index
      %c0_78 = arith.constant 0 : index
      %157 = vector.load %arg5[%c0_77, %c0_78] : memref<32x32xbf16, #tpu.memory_space<vmem>>, vector<32x32xbf16>
      %cst_79 = arith.constant dense<0.000000e+00> : vector<8x32xf32>
      %158 = tpu.matmul %156, %157, %cst_79 {dimension_numbers = #tpu.dot_dimension_numbers<[1], [0], [0], [1], [0, 0, 1, 1], [], []>} : vector<8x32xbf16>, vector<32x32xbf16>, vector<8x32xf32> -> vector<8x32xf32>
      %c1_80 = arith.constant 1 : index
      %c0_81 = arith.constant 0 : index
      %159 = vector.load %arg11[%c1_80, %c0_81] : memref<9x32xf32, #tpu.memory_space<vmem>>, vector<1x32xf32>
      %160 = vector.shape_cast %159 : vector<1x32xf32> to vector<32xf32>
      %161 = vector.shape_cast %160 : vector<32xf32> to vector<1x32xf32>
      %162 = vector.broadcast %161 : vector<1x32xf32> to vector<8x32xf32>
      %163 = arith.addf %158, %162 : vector<8x32xf32>
      %c0_82 = arith.constant 0 : index
      %c0_83 = arith.constant 0 : index
      %164 = vector.load %arg6[%c0_82, %c0_83] : memref<32x32xbf16, #tpu.memory_space<vmem>>, vector<32x32xbf16>
      %cst_84 = arith.constant dense<0.000000e+00> : vector<8x32xf32>
      %165 = tpu.matmul %156, %164, %cst_84 {dimension_numbers = #tpu.dot_dimension_numbers<[1], [0], [0], [1], [0, 0, 1, 1], [], []>} : vector<8x32xbf16>, vector<32x32xbf16>, vector<8x32xf32> -> vector<8x32xf32>
      %c2_85 = arith.constant 2 : index
      %c0_86 = arith.constant 0 : index
      %166 = vector.load %arg11[%c2_85, %c0_86] : memref<9x32xf32, #tpu.memory_space<vmem>>, vector<1x32xf32>
      %167 = vector.shape_cast %166 : vector<1x32xf32> to vector<32xf32>
      %168 = vector.shape_cast %167 : vector<32xf32> to vector<1x32xf32>
      %169 = vector.broadcast %168 : vector<1x32xf32> to vector<8x32xf32>
      %170 = arith.addf %165, %169 : vector<8x32xf32>
      %171 = vector.extract_strided_slice %163 {offsets = [0, 0], sizes = [8, 8], strides = [1, 1]} : vector<8x32xf32> to vector<8x8xf32>
      %172 = arith.truncf %171 : vector<8x8xf32> to vector<8x8xbf16>
      %c0_87 = arith.constant 0 : index
      %c0_88 = arith.constant 0 : index
      %c0_89 = arith.constant 0 : index
      %173 = vector.load %arg14[%c0_87, %c0_88, %c0_89] : memref<4x8x8xbf16, #tpu.memory_space<vmem>>, vector<1x8x8xbf16>
      %174 = vector.shape_cast %173 : vector<1x8x8xbf16> to vector<8x8xbf16>
      %175 = vector.shape_cast %172 : vector<8x8xbf16> to vector<1x8x8xbf16>
      tpu.vector_store %arg14[%c0_87, %c0_88, %c0_89], %175 {strides = array<i32>} : memref<4x8x8xbf16, #tpu.memory_space<vmem>>, vector<1x8x8xbf16>,
      %176 = vector.extract_strided_slice %170 {offsets = [0, 0], sizes = [8, 8], strides = [1, 1]} : vector<8x32xf32> to vector<8x8xf32>
      %177 = arith.truncf %176 : vector<8x8xf32> to vector<8x8xbf16>
      %c0_90 = arith.constant 0 : index
      %c0_91 = arith.constant 0 : index
      %c0_92 = arith.constant 0 : index
      %178 = vector.load %arg15[%c0_90, %c0_91, %c0_92] : memref<4x8x8xbf16, #tpu.memory_space<vmem>>, vector<1x8x8xbf16>
      %179 = vector.shape_cast %178 : vector<1x8x8xbf16> to vector<8x8xbf16>
      %180 = vector.shape_cast %177 : vector<8x8xbf16> to vector<1x8x8xbf16>
      tpu.vector_store %arg15[%c0_90, %c0_91, %c0_92], %180 {strides = array<i32>} : memref<4x8x8xbf16, #tpu.memory_space<vmem>>, vector<1x8x8xbf16>,
      %181 = vector.extract_strided_slice %163 {offsets = [0, 8], sizes = [8, 8], strides = [1, 1]} : vector<8x32xf32> to vector<8x8xf32>
      %182 = arith.truncf %181 : vector<8x8xf32> to vector<8x8xbf16>
      %c1_93 = arith.constant 1 : index
      %c0_94 = arith.constant 0 : index
      %c0_95 = arith.constant 0 : index
      %183 = vector.load %arg14[%c1_93, %c0_94, %c0_95] : memref<4x8x8xbf16, #tpu.memory_space<vmem>>, vector<1x8x8xbf16>
      %184 = vector.shape_cast %183 : vector<1x8x8xbf16> to vector<8x8xbf16>
      %185 = vector.shape_cast %182 : vector<8x8xbf16> to vector<1x8x8xbf16>
      tpu.vector_store %arg14[%c1_93, %c0_94, %c0_95], %185 {strides = array<i32>} : memref<4x8x8xbf16, #tpu.memory_space<vmem>>, vector<1x8x8xbf16>,
      %186 = vector.extract_strided_slice %170 {offsets = [0, 8], sizes = [8, 8], strides = [1, 1]} : vector<8x32xf32> to vector<8x8xf32>
      %187 = arith.truncf %186 : vector<8x8xf32> to vector<8x8xbf16>
      %c1_96 = arith.constant 1 : index
      %c0_97 = arith.constant 0 : index
      %c0_98 = arith.constant 0 : index
      %188 = vector.load %arg15[%c1_96, %c0_97, %c0_98] : memref<4x8x8xbf16, #tpu.memory_space<vmem>>, vector<1x8x8xbf16>
      %189 = vector.shape_cast %188 : vector<1x8x8xbf16> to vector<8x8xbf16>
      %190 = vector.shape_cast %187 : vector<8x8xbf16> to vector<1x8x8xbf16>
      tpu.vector_store %arg15[%c1_96, %c0_97, %c0_98], %190 {strides = array<i32>} : memref<4x8x8xbf16, #tpu.memory_space<vmem>>, vector<1x8x8xbf16>,
      %191 = vector.extract_strided_slice %163 {offsets = [0, 16], sizes = [8, 8], strides = [1, 1]} : vector<8x32xf32> to vector<8x8xf32>
      %192 = arith.truncf %191 : vector<8x8xf32> to vector<8x8xbf16>
      %c2_99 = arith.constant 2 : index
      %c0_100 = arith.constant 0 : index
      %c0_101 = arith.constant 0 : index
      %193 = vector.load %arg14[%c2_99, %c0_100, %c0_101] : memref<4x8x8xbf16, #tpu.memory_space<vmem>>, vector<1x8x8xbf16>
      %194 = vector.shape_cast %193 : vector<1x8x8xbf16> to vector<8x8xbf16>
      %195 = vector.shape_cast %192 : vector<8x8xbf16> to vector<1x8x8xbf16>
      tpu.vector_store %arg14[%c2_99, %c0_100, %c0_101], %195 {strides = array<i32>} : memref<4x8x8xbf16, #tpu.memory_space<vmem>>, vector<1x8x8xbf16>,
      %196 = vector.extract_strided_slice %170 {offsets = [0, 16], sizes = [8, 8], strides = [1, 1]} : vector<8x32xf32> to vector<8x8xf32>
      %197 = arith.truncf %196 : vector<8x8xf32> to vector<8x8xbf16>
      %c2_102 = arith.constant 2 : index
      %c0_103 = arith.constant 0 : index
      %c0_104 = arith.constant 0 : index
      %198 = vector.load %arg15[%c2_102, %c0_103, %c0_104] : memref<4x8x8xbf16, #tpu.memory_space<vmem>>, vector<1x8x8xbf16>
      %199 = vector.shape_cast %198 : vector<1x8x8xbf16> to vector<8x8xbf16>
      %200 = vector.shape_cast %197 : vector<8x8xbf16> to vector<1x8x8xbf16>
      tpu.vector_store %arg15[%c2_102, %c0_103, %c0_104], %200 {strides = array<i32>} : memref<4x8x8xbf16, #tpu.memory_space<vmem>>, vector<1x8x8xbf16>,
      %201 = vector.extract_strided_slice %163 {offsets = [0, 24], sizes = [8, 8], strides = [1, 1]} : vector<8x32xf32> to vector<8x8xf32>
      %202 = arith.truncf %201 : vector<8x8xf32> to vector<8x8xbf16>
      %c3_105 = arith.constant 3 : index
      %c0_106 = arith.constant 0 : index
      %c0_107 = arith.constant 0 : index
      %203 = vector.load %arg14[%c3_105, %c0_106, %c0_107] : memref<4x8x8xbf16, #tpu.memory_space<vmem>>, vector<1x8x8xbf16>
      %204 = vector.shape_cast %203 : vector<1x8x8xbf16> to vector<8x8xbf16>
      %205 = vector.shape_cast %202 : vector<8x8xbf16> to vector<1x8x8xbf16>
      tpu.vector_store %arg14[%c3_105, %c0_106, %c0_107], %205 {strides = array<i32>} : memref<4x8x8xbf16, #tpu.memory_space<vmem>>, vector<1x8x8xbf16>,
      %206 = vector.extract_strided_slice %170 {offsets = [0, 24], sizes = [8, 8], strides = [1, 1]} : vector<8x32xf32> to vector<8x8xf32>
      %207 = arith.truncf %206 : vector<8x8xf32> to vector<8x8xbf16>
      %c3_108 = arith.constant 3 : index
      %c0_109 = arith.constant 0 : index
      %c0_110 = arith.constant 0 : index
      %208 = vector.load %arg15[%c3_108, %c0_109, %c0_110] : memref<4x8x8xbf16, #tpu.memory_space<vmem>>, vector<1x8x8xbf16>
      %209 = vector.shape_cast %208 : vector<1x8x8xbf16> to vector<8x8xbf16>
      %210 = vector.shape_cast %207 : vector<8x8xbf16> to vector<1x8x8xbf16>
      tpu.vector_store %arg15[%c3_108, %c0_109, %c0_110], %210 {strides = array<i32>} : memref<4x8x8xbf16, #tpu.memory_space<vmem>>, vector<1x8x8xbf16>,
    } else {
    }
    %c0 = arith.constant 0 : index
    %c0_1 = arith.constant 0 : index
    %c0_2 = arith.constant 0 : index
    %3 = vector.load %arg3[%c0, %c0_1, %c0_2] : memref<1x8x32xf32, #tpu.memory_space<vmem>>, vector<1x8x32xf32>
    %4 = vector.shape_cast %3 : vector<1x8x32xf32> to vector<8x32xf32>
    %5 = arith.truncf %4 : vector<8x32xf32> to vector<8x32xbf16>
    %c0_3 = arith.constant 0 : index
    %c0_4 = arith.constant 0 : index
    %6 = vector.load %arg4[%c0_3, %c0_4] : memref<32x32xbf16, #tpu.memory_space<vmem>>, vector<32x32xbf16>
    %cst = arith.constant dense<0.000000e+00> : vector<8x32xf32>
    %7 = tpu.matmul %5, %6, %cst {dimension_numbers = #tpu.dot_dimension_numbers<[1], [0], [0], [1], [0, 0, 1, 1], [], []>} : vector<8x32xbf16>, vector<32x32xbf16>, vector<8x32xf32> -> vector<8x32xf32>
    %c0_5 = arith.constant 0 : index
    %c0_6 = arith.constant 0 : index
    %8 = vector.load %arg11[%c0_5, %c0_6] : memref<9x32xf32, #tpu.memory_space<vmem>>, vector<1x32xf32>
    %9 = vector.shape_cast %8 : vector<1x32xf32> to vector<32xf32>
    %10 = vector.shape_cast %9 : vector<32xf32> to vector<1x32xf32>
    %11 = vector.broadcast %10 : vector<1x32xf32> to vector<8x32xf32>
    %12 = arith.addf %7, %11 : vector<8x32xf32>
    %cst_7 = arith.constant 0.353553385 : f32
    %13 = vector.broadcast %cst_7 : f32 to vector<8x32xf32>
    %14 = arith.mulf %12, %13 : vector<8x32xf32>
    %15 = vector.extract_strided_slice %14 {offsets = [0, 0], sizes = [8, 8], strides = [1, 1]} : vector<8x32xf32> to vector<8x8xf32>
    %16 = arith.truncf %15 : vector<8x8xf32> to vector<8x8xbf16>
    %c0_8 = arith.constant 0 : index
    %c0_9 = arith.constant 0 : index
    %c0_10 = arith.constant 0 : index
    %17 = vector.load %arg16[%c0_8, %c0_9, %c0_10] : memref<4x8x8xbf16, #tpu.memory_space<vmem>>, vector<1x8x8xbf16>
    %18 = vector.shape_cast %17 : vector<1x8x8xbf16> to vector<8x8xbf16>
    %19 = vector.shape_cast %16 : vector<8x8xbf16> to vector<1x8x8xbf16>
    tpu.vector_store %arg16[%c0_8, %c0_9, %c0_10], %19 {strides = array<i32>} : memref<4x8x8xbf16, #tpu.memory_space<vmem>>, vector<1x8x8xbf16>,
    %20 = vector.extract_strided_slice %14 {offsets = [0, 8], sizes = [8, 8], strides = [1, 1]} : vector<8x32xf32> to vector<8x8xf32>
    %21 = arith.truncf %20 : vector<8x8xf32> to vector<8x8xbf16>
    %c1 = arith.constant 1 : index
    %c0_11 = arith.constant 0 : index
    %c0_12 = arith.constant 0 : index
    %22 = vector.load %arg16[%c1, %c0_11, %c0_12] : memref<4x8x8xbf16, #tpu.memory_space<vmem>>, vector<1x8x8xbf16>
    %23 = vector.shape_cast %22 : vector<1x8x8xbf16> to vector<8x8xbf16>
    %24 = vector.shape_cast %21 : vector<8x8xbf16> to vector<1x8x8xbf16>
    tpu.vector_store %arg16[%c1, %c0_11, %c0_12], %24 {strides = array<i32>} : memref<4x8x8xbf16, #tpu.memory_space<vmem>>, vector<1x8x8xbf16>,
    %25 = vector.extract_strided_slice %14 {offsets = [0, 16], sizes = [8, 8], strides = [1, 1]} : vector<8x32xf32> to vector<8x8xf32>
    %26 = arith.truncf %25 : vector<8x8xf32> to vector<8x8xbf16>
    %c2 = arith.constant 2 : index
    %c0_13 = arith.constant 0 : index
    %c0_14 = arith.constant 0 : index
    %27 = vector.load %arg16[%c2, %c0_13, %c0_14] : memref<4x8x8xbf16, #tpu.memory_space<vmem>>, vector<1x8x8xbf16>
    %28 = vector.shape_cast %27 : vector<1x8x8xbf16> to vector<8x8xbf16>
    %29 = vector.shape_cast %26 : vector<8x8xbf16> to vector<1x8x8xbf16>
    tpu.vector_store %arg16[%c2, %c0_13, %c0_14], %29 {strides = array<i32>} : memref<4x8x8xbf16, #tpu.memory_space<vmem>>, vector<1x8x8xbf16>,
    %30 = vector.extract_strided_slice %14 {offsets = [0, 24], sizes = [8, 8], strides = [1, 1]} : vector<8x32xf32> to vector<8x8xf32>
    %31 = arith.truncf %30 : vector<8x8xf32> to vector<8x8xbf16>
    %c3 = arith.constant 3 : index
    %c0_15 = arith.constant 0 : index
    %c0_16 = arith.constant 0 : index
    %32 = vector.load %arg16[%c3, %c0_15, %c0_16] : memref<4x8x8xbf16, #tpu.memory_space<vmem>>, vector<1x8x8xbf16>
    %33 = vector.shape_cast %32 : vector<1x8x8xbf16> to vector<8x8xbf16>
    %34 = vector.shape_cast %31 : vector<8x8xbf16> to vector<1x8x8xbf16>
    tpu.vector_store %arg16[%c3, %c0_15, %c0_16], %34 {strides = array<i32>} : memref<4x8x8xbf16, #tpu.memory_space<vmem>>, vector<1x8x8xbf16>,
    %c0_17 = arith.constant 0 : index
    %c0_18 = arith.constant 0 : index
    %c0_19 = arith.constant 0 : index
    %35 = vector.load %arg16[%c0_17, %c0_18, %c0_19] : memref<4x8x8xbf16, #tpu.memory_space<vmem>>, vector<4x8x8xbf16>
    %c0_20 = arith.constant 0 : index
    %c0_21 = arith.constant 0 : index
    %c0_22 = arith.constant 0 : index
    %36 = vector.load %arg14[%c0_20, %c0_21, %c0_22] : memref<4x8x8xbf16, #tpu.memory_space<vmem>>, vector<4x8x8xbf16>
    "tpu.trace_start"() <{level = 10 : i32, message = "hqd,hkd->hqk"}> : () -> ()
    %cst_23 = arith.constant dense<0.000000e+00> : vector<4x8x8xf32>
    %37 = tpu.matmul %35, %36, %cst_23 {dimension_numbers = #tpu.dot_dimension_numbers<[2], [2], [1], [1], [0, 0, 0, 1, 1, 1], [0], [0]>} : vector<4x8x8xbf16>, vector<4x8x8xbf16>, vector<4x8x8xf32> -> vector<4x8x8xf32>
    "tpu.trace_stop"() : () -> ()
    %cst_24 = arith.constant dense<0xFF800000> : vector<4x8xf32>
    %38 = vector.multi_reduction <maximumf>, %37, %cst_24 [2] : vector<4x8x8xf32> to vector<4x8xf32>
    %39 = vector.shape_cast %38 : vector<4x8xf32> to vector<4x8x1xf32>
    %40 = vector.broadcast %39 : vector<4x8x1xf32> to vector<4x8x8xf32>
    %41 = arith.subf %37, %40 : vector<4x8x8xf32>
    %42 = math.exp %41 : vector<4x8x8xf32>
    %cst_25 = arith.constant dense<0.000000e+00> : vector<4x8xf32>
    %43 = vector.multi_reduction <add>, %42, %cst_25 [2] : vector<4x8x8xf32> to vector<4x8xf32>
    %44 = vector.shape_cast %43 : vector<4x8xf32> to vector<4x8x1xf32>
    %45 = tpu.reciprocal %44 {approx = true} : vector<4x8x1xf32> -> vector<4x8x1xf32>
    %46 = vector.broadcast %45 : vector<4x8x1xf32> to vector<4x8x8xf32>
    %47 = arith.mulf %42, %46 : vector<4x8x8xf32>
    %c0_26 = arith.constant 0 : index
    %c0_27 = arith.constant 0 : index
    %c0_28 = arith.constant 0 : index
    %c0_29 = arith.constant 0 : index
    %48 = vector.load %arg13[%c0_26, %c0_27, %c0_28, %c0_29] : memref<1x4x8x8xf32, #tpu.memory_space<vmem>>, vector<1x4x8x8xf32>
    %49 = vector.shape_cast %48 : vector<1x4x8x8xf32> to vector<4x8x8xf32>
    %50 = vector.shape_cast %47 : vector<4x8x8xf32> to vector<1x4x8x8xf32>
    tpu.vector_store %arg13[%c0_26, %c0_27, %c0_28, %c0_29], %50 {strides = array<i32>} : memref<1x4x8x8xf32, #tpu.memory_space<vmem>>, vector<1x4x8x8xf32>,
    %51 = arith.truncf %47 : vector<4x8x8xf32> to vector<4x8x8xbf16>
    %c0_30 = arith.constant 0 : index
    %c0_31 = arith.constant 0 : index
    %c0_32 = arith.constant 0 : index
    %52 = vector.load %arg15[%c0_30, %c0_31, %c0_32] : memref<4x8x8xbf16, #tpu.memory_space<vmem>>, vector<4x8x8xbf16>
    "tpu.trace_start"() <{level = 10 : i32, message = "hqk,hkd->hqd"}> : () -> ()
    %cst_33 = arith.constant dense<0.000000e+00> : vector<4x8x8xf32>
    %53 = tpu.matmul %51, %52, %cst_33 {dimension_numbers = #tpu.dot_dimension_numbers<[2], [1], [1], [2], [0, 0, 0, 1, 1, 2], [0], [0]>} : vector<4x8x8xbf16>, vector<4x8x8xbf16>, vector<4x8x8xf32> -> vector<4x8x8xf32>
    "tpu.trace_stop"() : () -> ()
    %54 = vector.extract_strided_slice %53 {offsets = [0, 0, 0], sizes = [1, 8, 8], strides = [1, 1, 1]} : vector<4x8x8xf32> to vector<1x8x8xf32>
    %55 = vector.shape_cast %54 : vector<1x8x8xf32> to vector<8x8xf32>
    %c0_34 = arith.constant 0 : index
    %c0_35 = arith.constant 0 : index
    %56 = vector.load %arg17[%c0_34, %c0_35] : memref<8x32xf32, #tpu.memory_space<vmem>>, vector<8x8xf32>
    tpu.vector_store %arg17[%c0_34, %c0_35], %55 {strides = array<i32>} : memref<8x32xf32, #tpu.memory_space<vmem>>, vector<8x8xf32>,
    %57 = vector.extract_strided_slice %53 {offsets = [1, 0, 0], sizes = [1, 8, 8], strides = [1, 1, 1]} : vector<4x8x8xf32> to vector<1x8x8xf32>
    %58 = vector.shape_cast %57 : vector<1x8x8xf32> to vector<8x8xf32>
    %c0_36 = arith.constant 0 : index
    %c8 = arith.constant 8 : index
    %59 = vector.load %arg17[%c0_36, %c8] : memref<8x32xf32, #tpu.memory_space<vmem>>, vector<8x8xf32>
    tpu.vector_store %arg17[%c0_36, %c8], %58 {strides = array<i32>} : memref<8x32xf32, #tpu.memory_space<vmem>>, vector<8x8xf32>,
    %60 = vector.extract_strided_slice %53 {offsets = [2, 0, 0], sizes = [1, 8, 8], strides = [1, 1, 1]} : vector<4x8x8xf32> to vector<1x8x8xf32>
    %61 = vector.shape_cast %60 : vector<1x8x8xf32> to vector<8x8xf32>
    %c0_37 = arith.constant 0 : index
    %c16 = arith.constant 16 : index
    %62 = vector.load %arg17[%c0_37, %c16] : memref<8x32xf32, #tpu.memory_space<vmem>>, vector<8x8xf32>
    tpu.vector_store %arg17[%c0_37, %c16], %61 {strides = array<i32>} : memref<8x32xf32, #tpu.memory_space<vmem>>, vector<8x8xf32>,
    %63 = vector.extract_strided_slice %53 {offsets = [3, 0, 0], sizes = [1, 8, 8], strides = [1, 1, 1]} : vector<4x8x8xf32> to vector<1x8x8xf32>
    %64 = vector.shape_cast %63 : vector<1x8x8xf32> to vector<8x8xf32>
    %c0_38 = arith.constant 0 : index
    %c24 = arith.constant 24 : index
    %65 = vector.load %arg17[%c0_38, %c24] : memref<8x32xf32, #tpu.memory_space<vmem>>, vector<8x8xf32>
    tpu.vector_store %arg17[%c0_38, %c24], %64 {strides = array<i32>} : memref<8x32xf32, #tpu.memory_space<vmem>>, vector<8x8xf32>,
    %c0_39 = arith.constant 0 : index
    %c0_40 = arith.constant 0 : index
    %66 = vector.load %arg17[%c0_39, %c0_40] : memref<8x32xf32, #tpu.memory_space<vmem>>, vector<8x32xf32>
    %67 = arith.truncf %66 : vector<8x32xf32> to vector<8x32xbf16>
    %c0_41 = arith.constant 0 : index
    %c0_42 = arith.constant 0 : index
    %68 = vector.load %arg7[%c0_41, %c0_42] : memref<32x32xbf16, #tpu.memory_space<vmem>>, vector<32x32xbf16>
    %cst_43 = arith.constant dense<0.000000e+00> : vector<8x32xf32>
    %69 = tpu.matmul %67, %68, %cst_43 {dimension_numbers = #tpu.dot_dimension_numbers<[1], [0], [0], [1], [0, 0, 1, 1], [], []>} : vector<8x32xbf16>, vector<32x32xbf16>, vector<8x32xf32> -> vector<8x32xf32>
    %c3_44 = arith.constant 3 : index
    %c0_45 = arith.constant 0 : index
    %70 = vector.load %arg11[%c3_44, %c0_45] : memref<9x32xf32, #tpu.memory_space<vmem>>, vector<1x32xf32>
    %71 = vector.shape_cast %70 : vector<1x32xf32> to vector<32xf32>
    %72 = vector.shape_cast %71 : vector<32xf32> to vector<1x32xf32>
    %73 = vector.broadcast %72 : vector<1x32xf32> to vector<8x32xf32>
    %74 = arith.addf %69, %73 : vector<8x32xf32>
    %75 = arith.addf %4, %74 : vector<8x32xf32>
    %c4 = arith.constant 4 : index
    %c0_46 = arith.constant 0 : index
    %76 = vector.load %arg11[%c4, %c0_46] : memref<9x32xf32, #tpu.memory_space<vmem>>, vector<1x32xf32>
    %77 = vector.shape_cast %76 : vector<1x32xf32> to vector<32xf32>
    %c5 = arith.constant 5 : index
    %c0_47 = arith.constant 0 : index
    %78 = vector.load %arg11[%c5, %c0_47] : memref<9x32xf32, #tpu.memory_space<vmem>>, vector<1x32xf32>
    %79 = vector.shape_cast %78 : vector<1x32xf32> to vector<32xf32>
    %cst_48 = arith.constant dense<0.000000e+00> : vector<8xf32>
    %80 = vector.multi_reduction <add>, %75, %cst_48 [1] : vector<8x32xf32> to vector<8xf32>
    %81 = vector.shape_cast %80 : vector<8xf32> to vector<8x1xf32>
    %cst_49 = arith.constant 3.200000e+01 : f32
    %82 = vector.broadcast %cst_49 : f32 to vector<8x1xf32>
    %83 = arith.divf %81, %82 : vector<8x1xf32>
    %84 = vector.broadcast %83 : vector<8x1xf32> to vector<8x32xf32>
    %85 = arith.subf %75, %84 : vector<8x32xf32>
    %86 = arith.mulf %85, %85 : vector<8x32xf32>
    %cst_50 = arith.constant dense<0.000000e+00> : vector<8xf32>
    %87 = vector.multi_reduction <add>, %86, %cst_50 [1] : vector<8x32xf32> to vector<8xf32>
    %88 = vector.shape_cast %87 : vector<8xf32> to vector<8x1xf32>
    %cst_51 = arith.constant 3.200000e+01 : f32
    %89 = vector.broadcast %cst_51 : f32 to vector<8x1xf32>
    %90 = arith.divf %88, %89 : vector<8x1xf32>
    %91 = vector.broadcast %83 : vector<8x1xf32> to vector<8x32xf32>
    %92 = arith.subf %75, %91 : vector<8x32xf32>
    %cst_52 = arith.constant 9.99999974E-6 : f32
    %93 = vector.broadcast %cst_52 : f32 to vector<8x1xf32>
    %94 = arith.addf %90, %93 : vector<8x1xf32>
    %95 = math.rsqrt %94 : vector<8x1xf32>
    %96 = vector.broadcast %95 : vector<8x1xf32> to vector<8x32xf32>
    %97 = arith.mulf %92, %96 : vector<8x32xf32>
    %98 = vector.shape_cast %77 : vector<32xf32> to vector<1x32xf32>
    %99 = vector.broadcast %98 : vector<1x32xf32> to vector<8x32xf32>
    %100 = arith.mulf %97, %99 : vector<8x32xf32>
    %101 = vector.shape_cast %79 : vector<32xf32> to vector<1x32xf32>
    %102 = vector.broadcast %101 : vector<1x32xf32> to vector<8x32xf32>
    %103 = arith.addf %100, %102 : vector<8x32xf32>
    %104 = arith.truncf %103 : vector<8x32xf32> to vector<8x32xbf16>
    %c0_53 = arith.constant 0 : index
    %c0_54 = arith.constant 0 : index
    %105 = vector.load %arg8[%c0_53, %c0_54] : memref<32x128xbf16, #tpu.memory_space<vmem>>, vector<32x128xbf16>
    %cst_55 = arith.constant dense<0.000000e+00> : vector<8x128xf32>
    %106 = tpu.matmul %104, %105, %cst_55 {dimension_numbers = #tpu.dot_dimension_numbers<[1], [0], [0], [1], [0, 0, 1, 1], [], []>} : vector<8x32xbf16>, vector<32x128xbf16>, vector<8x128xf32> -> vector<8x128xf32>
    %c0_56 = arith.constant 0 : index
    %c0_57 = arith.constant 0 : index
    %107 = vector.load %arg10[%c0_56, %c0_57] : memref<1x128xf32, #tpu.memory_space<vmem>>, vector<1x128xf32>
    %108 = vector.shape_cast %107 : vector<1x128xf32> to vector<128xf32>
    %109 = vector.shape_cast %108 : vector<128xf32> to vector<1x128xf32>
    %110 = vector.broadcast %109 : vector<1x128xf32> to vector<8x128xf32>
    %111 = arith.addf %106, %110 : vector<8x128xf32>
    %cst_58 = arith.constant 0.000000e+00 : f32
    %112 = vector.broadcast %cst_58 : f32 to vector<8x128xf32>
    %113 = arith.maximumf %111, %112 : vector<8x128xf32>
    %114 = arith.truncf %113 : vector<8x128xf32> to vector<8x128xbf16>
    %c0_59 = arith.constant 0 : index
    %c0_60 = arith.constant 0 : index
    %115 = vector.load %arg9[%c0_59, %c0_60] : memref<128x32xbf16, #tpu.memory_space<vmem>>, vector<128x32xbf16>
    %cst_61 = arith.constant dense<0.000000e+00> : vector<8x32xf32>
    %116 = tpu.matmul %114, %115, %cst_61 {dimension_numbers = #tpu.dot_dimension_numbers<[1], [0], [0], [1], [0, 0, 1, 1], [], []>} : vector<8x128xbf16>, vector<128x32xbf16>, vector<8x32xf32> -> vector<8x32xf32>
    %c6 = arith.constant 6 : index
    %c0_62 = arith.constant 0 : index
    %117 = vector.load %arg11[%c6, %c0_62] : memref<9x32xf32, #tpu.memory_space<vmem>>, vector<1x32xf32>
    %118 = vector.shape_cast %117 : vector<1x32xf32> to vector<32xf32>
    %119 = vector.shape_cast %118 : vector<32xf32> to vector<1x32xf32>
    %120 = vector.broadcast %119 : vector<1x32xf32> to vector<8x32xf32>
    %121 = arith.addf %116, %120 : vector<8x32xf32>
    %122 = arith.addf %103, %121 : vector<8x32xf32>
    %c7 = arith.constant 7 : index
    %c0_63 = arith.constant 0 : index
    %123 = vector.load %arg11[%c7, %c0_63] : memref<9x32xf32, #tpu.memory_space<vmem>>, vector<1x32xf32>
    %124 = vector.shape_cast %123 : vector<1x32xf32> to vector<32xf32>
    %c8_64 = arith.constant 8 : index
    %c0_65 = arith.constant 0 : index
    %125 = vector.load %arg11[%c8_64, %c0_65] : memref<9x32xf32, #tpu.memory_space<vmem>>, vector<1x32xf32>
    %126 = vector.shape_cast %125 : vector<1x32xf32> to vector<32xf32>
    %cst_66 = arith.constant dense<0.000000e+00> : vector<8xf32>
    %127 = vector.multi_reduction <add>, %122, %cst_66 [1] : vector<8x32xf32> to vector<8xf32>
    %128 = vector.shape_cast %127 : vector<8xf32> to vector<8x1xf32>
    %cst_67 = arith.constant 3.200000e+01 : f32
    %129 = vector.broadcast %cst_67 : f32 to vector<8x1xf32>
    %130 = arith.divf %128, %129 : vector<8x1xf32>
    %131 = vector.broadcast %130 : vector<8x1xf32> to vector<8x32xf32>
    %132 = arith.subf %122, %131 : vector<8x32xf32>
    %133 = arith.mulf %132, %132 : vector<8x32xf32>
    %cst_68 = arith.constant dense<0.000000e+00> : vector<8xf32>
    %134 = vector.multi_reduction <add>, %133, %cst_68 [1] : vector<8x32xf32> to vector<8xf32>
    %135 = vector.shape_cast %134 : vector<8xf32> to vector<8x1xf32>
    %cst_69 = arith.constant 3.200000e+01 : f32
    %136 = vector.broadcast %cst_69 : f32 to vector<8x1xf32>
    %137 = arith.divf %135, %136 : vector<8x1xf32>
    %138 = vector.broadcast %130 : vector<8x1xf32> to vector<8x32xf32>
    %139 = arith.subf %122, %138 : vector<8x32xf32>
    %cst_70 = arith.constant 9.99999974E-6 : f32
    %140 = vector.broadcast %cst_70 : f32 to vector<8x1xf32>
    %141 = arith.addf %137, %140 : vector<8x1xf32>
    %142 = math.rsqrt %141 : vector<8x1xf32>
    %143 = vector.broadcast %142 : vector<8x1xf32> to vector<8x32xf32>
    %144 = arith.mulf %139, %143 : vector<8x32xf32>
    %145 = vector.shape_cast %124 : vector<32xf32> to vector<1x32xf32>
    %146 = vector.broadcast %145 : vector<1x32xf32> to vector<8x32xf32>
    %147 = arith.mulf %144, %146 : vector<8x32xf32>
    %148 = vector.shape_cast %126 : vector<32xf32> to vector<1x32xf32>
    %149 = vector.broadcast %148 : vector<1x32xf32> to vector<8x32xf32>
    %150 = arith.addf %147, %149 : vector<8x32xf32>
    %c0_71 = arith.constant 0 : index
    %c0_72 = arith.constant 0 : index
    %c0_73 = arith.constant 0 : index
    %151 = vector.load %arg12[%c0_71, %c0_72, %c0_73] : memref<1x8x32xf32, #tpu.memory_space<vmem>>, vector<1x8x32xf32>
    %152 = vector.shape_cast %151 : vector<1x8x32xf32> to vector<8x32xf32>
    %153 = vector.shape_cast %150 : vector<8x32xf32> to vector<1x8x32xf32>
    tpu.vector_store %arg12[%c0_71, %c0_72, %c0_73], %153 {strides = array<i32>} : memref<1x8x32xf32, #tpu.memory_space<vmem>>, vector<1x8x32xf32>,
    return
  }
  func.func @transform_0(%arg0: i32, %arg1: i32) -> (i32, i32, i32) {
    %c0_i32 = arith.constant 0 : i32
    %c0_i32_0 = arith.constant 0 : i32
    %c0_i32_1 = arith.constant 0 : i32
    return %arg0, %c0_i32, %c0_i32_0 : i32, i32, i32
  }
  func.func @transform_1(%arg0: i32, %arg1: i32) -> (i32, i32, i32) {
    %c0_i32 = arith.constant 0 : i32
    %c0_i32_0 = arith.constant 0 : i32
    return %arg0, %arg1, %c0_i32 : i32, i32, i32
  }
  func.func @transform_2(%arg0: i32, %arg1: i32) -> (i32, i32) {
    %c0_i32 = arith.constant 0 : i32
    %c0_i32_0 = arith.constant 0 : i32
    %c0_i32_1 = arith.constant 0 : i32
    return %c0_i32, %c0_i32_0 : i32, i32
  }
  func.func @transform_3(%arg0: i32, %arg1: i32) -> (i32, i32) {
    %c0_i32 = arith.constant 0 : i32
    %c0_i32_0 = arith.constant 0 : i32
    %c0_i32_1 = arith.constant 0 : i32
    return %c0_i32, %c0_i32_0 : i32, i32
  }
  func.func @transform_4(%arg0: i32, %arg1: i32) -> (i32, i32) {
    %c0_i32 = arith.constant 0 : i32
    %c0_i32_0 = arith.constant 0 : i32
    %c0_i32_1 = arith.constant 0 : i32
    return %c0_i32, %c0_i32_0 : i32, i32
  }
  func.func @transform_5(%arg0: i32, %arg1: i32) -> (i32, i32) {
    %c0_i32 = arith.constant 0 : i32
    %c0_i32_0 = arith.constant 0 : i32
    %c0_i32_1 = arith.constant 0 : i32
    return %c0_i32, %c0_i32_0 : i32, i32
  }
  func.func @transform_6(%arg0: i32, %arg1: i32) -> (i32, i32) {
    %c0_i32 = arith.constant 0 : i32
    %c0_i32_0 = arith.constant 0 : i32
    %c0_i32_1 = arith.constant 0 : i32
    return %c0_i32, %c0_i32_0 : i32, i32
  }
  func.func @transform_7(%arg0: i32, %arg1: i32) -> (i32, i32) {
    %c0_i32 = arith.constant 0 : i32
    %c0_i32_0 = arith.constant 0 : i32
    %c0_i32_1 = arith.constant 0 : i32
    return %c0_i32, %c0_i32_0 : i32, i32
  }
  func.func @transform_8(%arg0: i32, %arg1: i32) -> (i32, i32) {
    %c0_i32 = arith.constant 0 : i32
    %c0_i32_0 = arith.constant 0 : i32
    %c0_i32_1 = arith.constant 0 : i32
    return %c0_i32, %c0_i32_0 : i32, i32
  }
  func.func @transform_9(%arg0: i32, %arg1: i32) -> (i32, i32) {
    %c0_i32 = arith.constant 0 : i32
    %c0_i32_0 = arith.constant 0 : i32
    %c0_i32_1 = arith.constant 0 : i32
    return %c0_i32, %c0_i32_0 : i32, i32
  }
  func.func @transform_10(%arg0: i32, %arg1: i32) -> (i32, i32, i32) {
    %c0_i32 = arith.constant 0 : i32
    %c0_i32_0 = arith.constant 0 : i32
    return %arg0, %arg1, %c0_i32 : i32, i32, i32
  }
  func.func @transform_11(%arg0: i32, %arg1: i32) -> (i32, i32, i32, i32) {
    %c0_i32 = arith.constant 0 : i32
    %c0_i32_0 = arith.constant 0 : i32
    %c0_i32_1 = arith.constant 0 : i32
    return %arg0, %c0_i32, %arg1, %c0_i32_0 : i32, i32, i32, i32
  }
}

</mosaic_0001>

<bundles_post_ra>
// kernel: tpu_custom_call.1
= control target key start
LH: loop header
LB: loop body
LE: loop exit
PB: predicated region body
PF: predicated region fallthrough
CT: control target
= control target key end

     0   :  { %s2699_s0 = inlined_call_operand.vmem [shape: f32[2,8,32], index: 0, kind: input, shape index: {}]   ;;  %s2700_s1 = inlined_call_operand.vmem [shape: f32[2,8,32], index: 1, kind: input, shape index: {}]   ;;  %s2701_s2 = inlined_call_operand.vmem [shape: bf16[32,32], index: 2, kind: input, shape index: {}]   ;;  %s2702_s3 = inlined_call_operand.vmem [shape: bf16[32,32], index: 3, kind: input, shape index: {}]   ;;  %s2703_s4 = inlined_call_operand.vmem [shape: bf16[32,32], index: 4, kind: input, shape index: {}]   ;;  %s2704_s5 = inlined_call_operand.hbm [shape: bf16[32,32], index: 5, kind: input, shape index: {}]   ;;  %s2705_s6 = inlined_call_operand.hbm [shape: bf16[32,128], index: 6, kind: input, shape index: {}]   ;;  %s2706_s7 = inlined_call_operand.vmem [shape: bf16[128,32], index: 7, kind: input, shape index: {}]   ;;  %s2707_s8 = inlined_call_operand.hbm [shape: f32[1,128], index: 8, kind: input, shape index: {}]   ;;  %s2708_s9 = inlined_call_operand.vmem [shape: f32[9,32], index: 9, kind: input, shape index: {}]   ;;  %s2709_s10 = inlined_call_operand.hbm [shape: f32[2,8,32], index: 10, kind: output, shape index: {0}]   ;;  %s2710_s11 = inlined_call_operand.hbm [shape: f32[2,4,8,8], index: 11, kind: output, shape index: {1}]  }
   0x1   :  { %2714 = sst [smem:[#allocation22_spill]] %s2699_s0 }
   0x2   :  { %17 = vsyncpa [#allocation7], 0 }
   0x3   :  { %18 = vsyncpa [#allocation10], 0 }
   0x4   :  { %19 = vsyncpa [#allocation8], 0 }
   0x5   :  { %21 = vsyncpa [#allocation8 + $0x1], 0 }
   0x6   :  { %22 = vsyncpa [#allocation14], 0 }
   0x7   :  { %24 = vsyncpa [#allocation14 + $0x1], 0  ;;  %s2306_s17 = smov 0   ;;  %s2308_s18 = smov 0  }
   0x8   :  { %s2310_s19 = smov 0   ;;  %s2312_s20 = smov 0  }
   0x9   :  { %s2314_s21 = smov 0   ;;  %s2316_s22 = smov 0  }
   0xa LB: > { %2715 = sst [smem:[#allocation19_spill]] %s2224_s21  ;;  %s1678_s23 = sadd.s32 4294967295, %s2228_s22   ;;  %s2228_s22 = sphi %s2316_s22, %s30_s22   ;;  %s2224_s21 = sphi %s2314_s21, %s2729_s21   ;;  %s2220_s20 = sphi %s2312_s20, %s2728_s20   ;;  %s2216_s19 = sphi %s2310_s19, %s2732_s19   ;;  %s2212_s18 = sphi %s2308_s18, %s2731_s18   ;;  %s2208_s17 = sphi %s2306_s17, %s2730_s17  }
   0xb   : > { %s1679_s24 = sadd.s32 4294967294, %s2228_s22   ;;  %s42_s25 = sadd.s32 1, %s2224_s21 }
   0xc   : > { %s273_s26 = sadd.s32 1, %s2216_s19  ;;  %p44_p0 = scmp.ge.s32.totalorder %s42_s25, 2 }
   0xd   : > { %p283_p1 = scmp.ne.s32.totalorder %s2216_s19, %s2212_s18  ;;  %p284_p2 = scmp.eq.s32.totalorder %s1678_s23, 1 }
   0xe   : > { %p289_p3 = scmp.ne.s32.totalorder %s2212_s18, %s2208_s17  ;;  %s2734_s25 = smov (%p44_p0, %s42_s25), 0 }
   0xf   : > { %2716 = sst [smem:[#allocation20_spill]] %s2734_s25  ;;  %p2346_p4 = por %p284_p2, %p283_p1 }
  0x10   : > { %p290_p5 = scmp.eq.s32.totalorder %s1679_s24, 1  ;;  %s268_s28 = ssub.s32 %s2224_s21, %s2734_s25 }
  0x11   : > { %p1680_p6 = scmp.ge.s32.totalorder %s2228_s22, 1  ;;  %p271_p7 = scmp.eq.s32.totalorder %s268_s28, 0 }
  0x12   : > { %p2353_p8 = por %p290_p5, %p289_p3  ;;  %p325_p9 = scmp.lt.s32.totalorder %s2228_s22, 3 }
  0x13   : > { %s2359_s30 = scalar_select %p271_p7, %s2216_s19, %s273_s26  }
  0x14   : > { %s2718_s29 = scalar_select %p2353_p8, 1, 0 }
  0x15   : > { %2719 = sst [smem:[#allocation21_spill]] %s2359_s30  ;;  %p2361_p10 = pnand %p1680_p6, %p325_p9 }
  0x16   : > { %p2365_p11 = scmp.eq.s32.totalorder %s1678_s23, 0  ;;  %s2230_s14 = smov [#allocation9]  }
  0x17   : > { %p1912_p12 = pneg %p2361_p10  ;;  %s359_s15 = sshll.u32 %s2230_s14, 4  ;;  %s360_s15 = int_to_ptr.vmem [resolvable:$true] %s359_s15 }
  0x18   : > { %s2231_s24 = smov [#allocation6]   ;;  %s2047_s23 = scalar_lea.vmem %s360_s15, 256 }
  0x19   : > { %p2373_p13 = pnand %p2365_p11, %p1912_p12  ;;  %s346_s26 = sshll.u32 %s2231_s24, 4  ;;  %s347_s26 = int_to_ptr.vmem [resolvable:$true] %s346_s26 }
  0x1a   : > { %p2048_p1 = scmp.ne.s32.totalorder %s360_s15, %s2047_s23  ;;  %p2055_p5 = scmp.lt.s32.totalorder %s360_s15, %s360_s15 }
  0x1b   : > { %p2038_p0 = pneg %p2373_p13  ;;  %p2056_p6 = scmp.lt.s32.totalorder %s2047_s23, %s2047_s23 }
  0x1d   : > { %p2050_p2 = pnand %p2048_p1, %p2038_p0  ;;  %p2057_p7 = por %p2056_p6, %p2055_p5 }
  0x1f   : > { %p2051_p3 = pneg %p2050_p2 }
  0x21   : > { %p2058_p9 = pnand %p2057_p7, %p2051_p3 }
  0x23   : > { %2061 = shalt.err (!%p2058_p9)
}
  0x24   : > { %s2232_s28 = smov 64   ;;  %s2233_s14 = smov 4  }
  0x25   : > { %1918 = dma.hbm_to_vmem [thread:$0]  (!%p2373_p13), %s2705_s6, 256, %s360_s15, [#allocation10], %s2232_s28, %s2232_s28, %s2233_s14  }
  0x26   : > { %s2073_s21 = scalar_lea.vmem %s347_s26, 256  ;;  %p2081_p8 = scmp.lt.s32.totalorder %s347_s26, %s347_s26 }
  0x27   : > { %p2074_p12 = scmp.ne.s32.totalorder %s347_s26, %s2073_s21  ;;  %p2082_p5 = scmp.lt.s32.totalorder %s2073_s21, %s2073_s21 }
  0x29   : > { %p2076_p1 = pnand %p2074_p12, %p2038_p0  ;;  %p2083_p3 = por %p2082_p5, %p2081_p8 }
  0x2b   : > { %p2077_p2 = pneg %p2076_p1 }
  0x2d   : > { %p2084_p6 = pnand %p2083_p3, %p2077_p2 }
  0x2f   : > { %2087 = shalt.err (!%p2084_p6)
}
  0x30   : > { %1915 = dma.hbm_to_vmem [thread:$0]  (!%p2373_p13), %s2704_s5, 256, %s347_s26, [#allocation7], %s2232_s28, %s2232_s28, %s2233_s14  }
  0x31   : > { %s2234_s25 = smov [#allocation11]  }
  0x32   : > { %s376_s15 = sshll.u32 %s2234_s25, 4  ;;  %s377_s15 = int_to_ptr.vmem [resolvable:$true] %s376_s15 }
  0x33   : > { %s2099_s24 = scalar_lea.vmem %s377_s15, 16  ;;  %s2106_s21 = scalar_lea.vmem %s377_s15, 32 }
  0x34   : > { %p2100_p7 = scmp.ne.s32.totalorder %s377_s15, %s2099_s24  ;;  %p2107_p8 = scmp.lt.s32.totalorder %s377_s15, %s377_s15 }
  0x35   : > { %p2108_p1 = scmp.lt.s32.totalorder %s2106_s21, %s2099_s24 }
  0x36   : > { %p2102_p9 = pnand %p2100_p7, %p2038_p0 }
  0x37   : > { %p2109_p2 = por %p2108_p1, %p2107_p8 }
  0x38   : > { %p2103_p12 = pneg %p2102_p9 }
  0x3a   : > { %p2110_p5 = pnand %p2109_p2, %p2103_p12 }
  0x3c   : > { %2113 = shalt.err (!%p2110_p5)
}
  0x3d   : > { %1921 = dma.hbm_to_vmem [thread:$0]  (!%p2373_p13), %s2707_s8, 16, %s377_s15, [#allocation10]  }
  0x3e   : > { %409 = sbr.rel (%p2361_p10) target bundleno = 2476 (0x9ac), region = 60 }
  0x43   : > { %2191 = dma.done.wait (%p2365_p11), [#allocation7], 256  }
  0x44   : > { %2193 = vsyncadd (%p2365_p11), [#allocation7], 4294967040 }
  0x45   : > { %2195 = dma.done.wait (%p2365_p11), [#allocation10], 272  }
  0x46   : > { %2197 = vsyncadd (%p2365_p11), [#allocation10], 4294967024  ;;  %p468_p0 = scmp.lt.s32.totalorder %s2220_s20, 1  ;;  %v2235_v0 = vmov 0.0   ;;  %vm2236_vm0 = vmmov 0   ;;  %s2723_s0 = sld [smem:[#allocation22_spill]] }
  0x47   : > { %1788 = vmatprep.subr.bf16.mxu0 %v2235_v0  ;;  %1792 = vmatprep.mubr.msk.bf16.mxu0 %vm2236_vm0, %v2235_v0  ;;  %v1998_v1 = vld [vmem:[%s2702_s3 + $0x8] sm:$0xff]   ;;  %v1999_v2 = vld [vmem:[%s2702_s3] sm:$0xff]   ;;  %vm507_vm1 = vcmask 261120   ;;  %vm613_vm2 = vcmask 60416   ;;  %s2237_s30 = smov 104   ;;  %s2238_s23 = smov 120  }
  0x48   : > { %s469_s12 = scalar_select %p468_p0, %s2220_s20, 1  ;;  %1812 = vmatprep.subr.bf16.mxu1 %v2235_v0  ;;  %1814 = vmatprep.mubr.msk.bf16.mxu1 %vm2236_vm0, %v2235_v0  ;;  %v2000_v5 = vld [vmem:[%s2703_s4 + $0x8] sm:$0xff]   ;;  %v2001_v6 = vld [vmem:[%s2703_s4] sm:$0xff]   ;;  %vm750_vm3 = vcmask 64512   ;;  %vm994_vm4 = vcmask 1043456   ;;  %vm1181_vm5 = vcmask 130112  }
  0x49   : > { %1789 = vmatpush3.bf16.msra.mxu0 %v1998_v1  ;;  %v2002_v7 = vld [vmem:[%s2701_s2 + $0x8] sm:$0xff]   ;;  %v2003_v9 = vld [vmem:[%s2701_s2] sm:$0xff]   ;;  %s2239_s13 = smov 112   ;;  %s2241_s21 = smov 16   ;;  %vm1187_vm6 = vcmask 195712   ;;  %vm1193_vm7 = vcmask 261312  }
  0x4a   : > { %s1691_s16 = sshll.u32 %s469_s12, 3  ;;  %1790 = vmatprep.subr.bf16.mxu0 %v2235_v0  ;;  %v1693_v11 = vld [vmem:[%s2708_s9 + $0x1] ss:$0 sm:$0xff]  ;;  %v1697_v18 = vld [vmem:[%s2708_s9 + $0x2] ss:$0 sm:$0xff] }
  0x4b   : > { %s478_s25 = scalar_lea.vmem %s2700_s1, %s1691_s16  ;;  %v1703_v27 = vld [vmem:[%s2708_s9] ss:$0 sm:$0xff] }
  0x4c   : > { %s471_s28 = scalar_lea.vmem %s2723_s0, %s1691_s16  ;;  %v2450_v8 = vld [vmem:[%s478_s25] sm:$0xff]  ;;  %s2531_s25 = sand.u32 1, %s2212_s18  }
  0x4d   : > { %v484_v3 = vld [vmem:[%s471_s28] sm:$0xff]  ;;  %1791 = vmatpush3.bf16.msra.mxu0 %v1999_v2  ;;  %v654_v10 = vpack.c.bf16 %v2450_v8, %v2450_v8  ;;  %s1690_s15 = sshll.u32 %s2531_s25, 5  ;;  %s2713_s16 = smov 8  }
  0x4e   : > { %v485_v4 = vpack.c.bf16 %v484_v3, %v484_v3  ;;  %1796 = vmatprep.subr.bf16.mxu0 %v2235_v0  ;;  %s2534_s24 = scalar_lea.vmem [#allocation13], %s1690_s15  ;;  %s2243_s28 = smov [#allocation13]  }
  0x4f   : > { %s1527_s15 = sshll.u32 %s2534_s24, 4  ;;  %s2118_s14 = sshll.u32 %s2243_s28, 4  ;;  %s2621_s15 = int_to_ptr.vmem [resolvable:$true] %s1527_s15  ;;  %s2119_s14 = int_to_ptr.vmem [resolvable:$false] %s2118_s14 }
  0x50   : > { %1793 = vmatmul.mubr.msk.bf16.vlgmr.msra.gmra.mxu0 %vm507_vm1, %v485_v4  ;;  %p2121_p3 = scmp.lt.s32.totalorder %s2621_s15, %s2119_s14 }
  0x51   : > { %1797 = vmatpush3.bf16.msra.mxu0 %v2000_v5  ;;  %1800 = vmatprep.mubr.msk.bf16.mxu0 %vm2236_vm0, %v2235_v0 }
  0x52   : > { %1798 = vmatprep.subr.bf16.mxu0 %v2235_v0 }
  0x55   : > { %1799 = vmatpush3.bf16.msra.mxu0 %v2001_v6 }
  0x56   : > { %1804 = vmatprep.subr.bf16.mxu0 %v2235_v0 }
  0x58   : > { %1801 = vmatmul.mubr.msk.bf16.vlgmr.msra.gmra.mxu0 %vm507_vm1, %v485_v4 }
  0x59   : > { %1805 = vmatpush3.bf16.msra.mxu0 %v2002_v7  ;;  %1808 = vmatprep.mubr.msk.bf16.mxu0 %vm2236_vm0, %v2235_v0 }
  0x5a   : > { %1806 = vmatprep.subr.bf16.mxu0 %v2235_v0 }
  0x5d   : > { %1807 = vmatpush3.bf16.msra.mxu0 %v2003_v9 }
  0x5e   : > { %1818 = vmatprep.subr.bf16.mxu0 %v2235_v0 }
  0x60   : > { %1809 = vmatmul.mubr.msk.bf16.vlgmr.msra.gmra.mxu0 %vm507_vm1, %v654_v10 }
  0x61   : > { %1820 = vmatprep.mubr.msk.bf16.mxu0 %vm2236_vm0, %v2235_v0 }
 0x110   : > { %v545_v12 = vpop.f32.mrf.mxu0 }
 0x111   : > { %v546_v13 = vadd.f32 %v1693_v11, %v545_v12 }
 0x112   : > { %v1794_v14 = vpop.f32.mrf.mxu0 }
 0x113   : > { %v612_v15 = vpack.c.bf16 %v546_v13, %v546_v13 }
 0x114   : > { %v548_v16 = vpop.f32.mrf.mxu0 }
 0x115   : > { %614 = vst.msk [vmem:[#allocation2] sm:$0xf] %vm613_vm2, %v612_v15  ;;  %643 = vrot.lane.b32.xlu1 %v612_v15, %s2237_s30  ;;  %620 = vrot.lane.b32.xlu0 %v612_v15, %s2238_s23 }
 0x116   : > { %v1795_v17 = vpop.f32.mrf.mxu0 }
 0x118   : > { %v606_v19 = vpop.f32.mrf.mxu0 }
 0x119   : > { %v607_v20 = vadd.f32 %v1697_v18, %v606_v19  ;;  %633 = vrot.lane.b32.xlu0 %v612_v15, %s2239_s13 }
 0x11a   : > { %v1802_v21 = vpop.f32.mrf.mxu0 }
 0x11b   : > { %v2474_v22 = vpack.c.bf16 %v607_v20, %v607_v20 }
 0x11c   : > { %v609_v23 = vpop.f32.mrf.mxu0  ;;  %v746_v24 = vld [vmem:[#allocation2] sm:$0xf] }
 0x11d   : > { %616 = vst.msk [vmem:[#allocation3] sm:$0xf] %vm613_vm2, %v2474_v22  ;;  %v755_v25 = vsel %vm750_vm3, %v746_v24, 0 }
 0x11e   : > { %v1803_v26 = vpop.f32.mrf.mxu0  ;;  %1813 = vmatpush3.bf16.xpose.msra.mxu1 %v755_v25 }
 0x11f   : > { %1824 = vmatprep.subr.bf16.mxu1 %v2235_v0 }
 0x120   : > { %v714_v28 = vpop.f32.mrf.mxu0 }
 0x121   : > { %v715_v29 = vadd.f32 %v1703_v27, %v714_v28 }
 0x122   : > { %v1810_v30 = vpop.f32.mrf.mxu0 }
 0x123   : > { %v720_v31 = vmul.f32 0.35355338, %v715_v29 }
 0x124   : > { %v717_v32 = vpop.f32.mrf.mxu0  ;;  %v987_v47 = vld [vmem:[#allocation3] sm:$0xf] }
 0x125   : > { %v721_v33 = vpack.c.bf16 %v720_v31, %v720_v31  ;;  %v996_v51 = vsel %vm994_vm4, %v987_v47, 0 }
 0x126   : > { %v1811_v34 = vpop.f32.mrf.mxu0 }
 0x127   : > { %723 = vst.msk [vmem:[#allocation4] sm:$0xf] %vm613_vm2, %v721_v33  ;;  %732 = vrot.lane.b32.xlu0 %v721_v33, %s2239_s13  ;;  %727 = vrot.lane.b32.xlu1 %v721_v33, %s2238_s23 }
 0x12b   : > { %737 = vrot.lane.b32.xlu1 %v721_v33, %s2237_s30 }
 0x12e   : > { %v742_v35 = vld [vmem:[#allocation4] sm:$0xf] }
 0x12f   : > { %1815 = vmatmul.mubr.msk.bf16.vlgmr.msra.gmra.mxu1 %vm750_vm3, %v742_v35 }
 0x130   : > { %1826 = vmatprep.mubr.msk.bf16.mxu1 %vm2236_vm0, %v2235_v0 }
 0x187   : > { %v644_v36 = vpop.permute.xlu1 %643  ;;  %v621_v37 = vpop.permute.xlu0 %620 }
 0x188   : > { %647 = vst.msk [vmem:[#allocation2 + $0xc] sm:$0xf] %vm613_vm2, %v644_v36  ;;  %624 = vst.msk [vmem:[#allocation2 + $0x4] sm:$0xf] %vm613_vm2, %v621_v37 }
 0x18b   : > { %v634_v38 = vpop.permute.xlu0 %633 }
 0x18c   : > { %637 = vst.msk [vmem:[#allocation2 + $0x8] sm:$0xf] %vm613_vm2, %v634_v38 }
 0x18f   : > { %v747_v39 = vld [vmem:[#allocation2 + $0x4] sm:$0xf]  ;;  %v749_v46 = vld [vmem:[#allocation2 + $0xc] sm:$0xf] }
 0x190   : > { %v801_v40 = vsel %vm750_vm3, %v747_v39, 0  ;;  %v893_v50 = vsel %vm750_vm3, %v749_v46, 0 }
 0x191   : > { %1819 = vmatpush3.bf16.xpose.msra.mxu0 %v801_v40 }
 0x192   : > { %1830 = vmatprep.subr.bf16.mxu0 %v2235_v0 }
 0x193   : > { %v748_v41 = vld [vmem:[#allocation2 + $0x8] sm:$0xf] }
 0x194   : > { %v847_v42 = vsel %vm750_vm3, %v748_v41, 0 }
 0x195   : > { %1825 = vmatpush3.bf16.xpose.msra.mxu1 %v847_v42 }
 0x196   : > { %1836 = vmatprep.subr.bf16.mxu1 %v2235_v0 }
 0x199   : > { %v733_v43 = vpop.permute.xlu0 %732  ;;  %v728_v44 = vpop.permute.xlu1 %727 }
 0x19a   : > { %736 = vst.msk [vmem:[#allocation4 + $0x8] sm:$0xf] %vm613_vm2, %v733_v43  ;;  %731 = vst.msk [vmem:[#allocation4 + $0x4] sm:$0xf] %vm613_vm2, %v728_v44 }
 0x19d   : > { %v738_v45 = vpop.permute.xlu1 %737 }
 0x19e   : > { %741 = vst.msk [vmem:[#allocation4 + $0xc] sm:$0xf] %vm613_vm2, %v738_v45 }
 0x1a1   : > { %v743_v48 = vld [vmem:[#allocation4 + $0x4] sm:$0xf]  ;;  %v744_v49 = vld [vmem:[#allocation4 + $0x8] sm:$0xf] }
 0x1a2   : > { %1821 = vmatmul.mubr.msk.bf16.vlgmr.msra.gmra.mxu0 %vm750_vm3, %v743_v48  ;;  %1827 = vmatmul.mubr.msk.bf16.vlgmr.msra.gmra.mxu1 %vm750_vm3, %v744_v49 }
 0x1a3   : > { %1831 = vmatpush3.bf16.xpose.msra.mxu0 %v893_v50  ;;  %1837 = vmatpush3.bf16.msra.mxu1 %v996_v51 }
 0x1a4   : > { %1832 = vmatprep.mubr.msk.bf16.mxu0 %vm2236_vm0, %v2235_v0  ;;  %1842 = vmatprep.subr.bf16.mxu0 %v2235_v0 }
 0x1a5   : > { %1838 = vmatprep.mubr.msk.bf16.mxu1 %vm2236_vm0, %v2235_v0  ;;  %1848 = vmatprep.subr.bf16.mxu1 %v2235_v0  ;;  %v745_v52 = vld [vmem:[#allocation4 + $0xc] sm:$0xf] }
 0x1aa   : > { %1833 = vmatmul.mubr.msk.bf16.vlgmr.msra.gmra.mxu0 %vm750_vm3, %v745_v52 }
 0x1ab   : > { %1844 = vmatprep.mubr.msk.bf16.mxu0 %vm2236_vm0, %v2235_v0 }
 0x1ef   : > { %v791_v53 = vpop.f32.mrf.mxu1 }
 0x1f0   : > { %v935_v54 = vsel %vm750_vm3, %v791_v53, -inf }
 0x1f1   : > { %936 = vmax.xlane.f32.xlu0 %v935_v54  ;;  %v1816_v55 = vpop.f32.mrf.mxu1 }
 0x1f3   : > { %v794_v56 = vpop.f32.mrf.mxu1 }
 0x1f5   : > { %v1817_v57 = vpop.f32.mrf.mxu1 }
 0x262   : > { %v837_v58 = vpop.f32.mrf.mxu0  ;;  %v883_v59 = vpop.f32.mrf.mxu1 }
 0x263   : > { %v941_v60 = vsel %vm750_vm3, %v883_v59, -inf  ;;  %v938_v61 = vsel %vm750_vm3, %v837_v58, -inf }
 0x264   : > { %942 = vmax.xlane.f32.xlu0 %v941_v60  ;;  %v1828_v62 = vpop.f32.mrf.mxu1  ;;  %939 = vmax.xlane.f32.xlu1 %v938_v61  ;;  %v1822_v63 = vpop.f32.mrf.mxu0  ;;  %v2004_v60 = vld [vmem:[#allocation6 + $0x8] sm:$0xff]   ;;  %v2005_v61 = vld [vmem:[#allocation6] sm:$0xff]  }
 0x266   : > { %v840_v1 = vpop.f32.mrf.mxu0  ;;  %v886_v2 = vpop.f32.mrf.mxu1 }
 0x268   : > { %v1823_v3 = vpop.f32.mrf.mxu0  ;;  %v1829_v4 = vpop.f32.mrf.mxu1 }
 0x26a   : > { %v929_v5 = vpop.f32.mrf.mxu0 }
 0x26b   : > { %v944_v6 = vsel %vm750_vm3, %v929_v5, -inf }
 0x26c   : > { %945 = vmax.xlane.f32.xlu0 %v944_v6  ;;  %v1834_v7 = vpop.f32.mrf.mxu0 }
 0x26e   : > { %v932_v9 = vpop.f32.mrf.mxu0 }
 0x270   : > { %v1835_v10 = vpop.f32.mrf.mxu0 }
 0x275   : > { %628 = vrot.lane.b32.xlu1 %v2474_v22, %s2238_s23 }
 0x27a   : > { %v937_v11 = vpop.xlane.xlu0 %936 }
 0x27b   : > { %v947_v12 = vsub.f32 %v791_v53, %v937_v11 }
 0x27d   : > { %v951_v13 = vmul.f32 1.442695, %v947_v12 }
 0x27f   : > { %2016 = vpow2.f32 %v951_v13 }
 0x28c   : > { %v2017_v14 = vpop.eup %2016 }
 0x28d   : > { %v959_v15 = vsel %vm750_vm3, %v2017_v14, 0.0 }
 0x299   : > { %960 = vadd.xlane.f32.xlu1 %v959_v15 }
 0x2ed   : > { %v943_v16 = vpop.xlane.xlu0 %942  ;;  %v940_v17 = vpop.xlane.xlu1 %939 }
 0x2ee   : > { %v949_v18 = vsub.f32 %v883_v59, %v943_v16  ;;  %v948_v19 = vsub.f32 %v837_v58, %v940_v17  ;;  %v1716_v17 = vld [vmem:[%s2708_s9 + $0x3] ss:$0 sm:$0xff] }
 0x2f0   : > { %v955_v20 = vmul.f32 1.442695, %v949_v18  ;;  %v953_v21 = vmul.f32 1.442695, %v948_v19 }
 0x2f1   : > { %v629_v23 = vpop.permute.xlu1 %628 }
 0x2f2   : > { %2018 = vpow2.f32 %v955_v20  ;;  %632 = vst.msk [vmem:[#allocation3 + $0x4] sm:$0xf] %vm613_vm2, %v629_v23 }
 0x2f3   : > { %2020 = vpow2.f32 %v953_v21 }
 0x2f5   : > { %v946_v24 = vpop.xlane.xlu0 %945 }
 0x2f6   : > { %v950_v25 = vsub.f32 %v929_v5, %v946_v24 }
 0x2f8   : > { %v957_v26 = vmul.f32 1.442695, %v950_v25 }
 0x2f9   : > { %v988_v27 = vld [vmem:[#allocation3 + $0x4] sm:$0xf] }
 0x2fa   : > { %2022 = vpow2.f32 %v957_v26  ;;  %v1042_v28 = vsel %vm994_vm4, %v988_v27, 0 }
 0x2fb   : > { %1843 = vmatpush3.bf16.msra.mxu0 %v1042_v28 }
 0x2fc   : > { %1854 = vmatprep.subr.bf16.mxu0 %v2235_v0 }
 0x2ff   : > { %v2019_v29 = vpop.eup %2018 }
 0x300   : > { %v2021_v30 = vpop.eup %2020  ;;  %v965_v31 = vsel %vm750_vm3, %v2019_v29, 0.0 }
 0x301   : > { %966 = vadd.xlane.f32.xlu1 %v965_v31  ;;  %v962_v32 = vsel %vm750_vm3, %v2021_v30, 0.0  ;;  %v2006_v31 = vld [vmem:[#allocation9 + $0x8] sm:$0xff]  }
 0x302   : > { %963 = vadd.xlane.f32.xlu0 %v962_v32  ;;  %v2007_v32 = vld [vmem:[#allocation9] sm:$0xff]  }
 0x307   : > { %v2023_v33 = vpop.eup %2022 }
 0x308   : > { %v968_v34 = vsel %vm750_vm3, %v2023_v33, 0.0 }
 0x309   : > { %969 = vadd.xlane.f32.xlu0 %v968_v34  ;;  %v2010_v34 = vld [vmem:[%s2706_s7 + $0x28] sm:$0xff]  }
 0x312   : > { %648 = vrot.lane.b32.xlu1 %v2474_v22, %s2237_s30  ;;  %s2242_s30 = smov 24  }
 0x31f   : > { %638 = vrot.lane.b32.xlu0 %v2474_v22, %s2239_s13  ;;  %s2114_s13 = scalar_lea.vmem %s2621_s15, 512 }
 0x320   : > { %p2115_p10 = scmp.ne.s32.totalorder %s2621_s15, %s2114_s13 }
 0x322   : > { %v961_v35 = vpop.xlane.xlu1 %960  ;;  %p2116_p11 = pnand %p2115_p10, %p2346_p4 }
 0x323   : > { %2024 = vrcp.f32 %v961_v35  ;;  %v2011_v35 = vld [vmem:[%s2706_s7 + $0x20] sm:$0xff]  }
 0x324   : > { %p2117_p13 = pneg %p2116_p11 }
 0x330   : > { %v2025_v36 = vpop.eup %2024 }
 0x331   : > { %v975_v37 = vmul.f32 %v2025_v36, %v2017_v14  ;;  %v2012_v36 = vld [vmem:[%s2706_s7 + $0x18] sm:$0xff]  }
 0x333   : > { %v983_v38 = vpack.c.bf16 %v975_v37, %v975_v37  ;;  %979 = vst.msk [vmem:[%s2534_s24] sm:$0xff] %vm750_vm3, %v975_v37  ;;  %v2013_v37 = vld [vmem:[%s2706_s7 + $0x10] sm:$0xff]  }
 0x335   : > { %1839 = vmatmul.mubr.msk.bf16.vlgmr.msra.gmra.mxu1 %vm750_vm3, %v983_v38 }
 0x336   : > { %1850 = vmatprep.mubr.msk.bf16.mxu1 %vm2236_vm0, %v2235_v0 }
 0x38a   : > { %v967_v22 = vpop.xlane.xlu1 %966 }
 0x38b   : > { %2026 = vrcp.f32 %v967_v22  ;;  %v964_v39 = vpop.xlane.xlu0 %963 }
 0x38c   : > { %2028 = vrcp.f32 %v964_v39 }
 0x38e   : > { %v649_v40 = vpop.permute.xlu1 %648 }
 0x38f   : > { %652 = vst.msk [vmem:[#allocation3 + $0xc] sm:$0xf] %vm613_vm2, %v649_v40 }
 0x392   : > { %v970_v41 = vpop.xlane.xlu0 %969 }
 0x393   : > { %2030 = vrcp.f32 %v970_v41  ;;  %v1720_v41 = vld [vmem:[%s2708_s9 + $0x4] ss:$0 sm:$0xff] }
 0x396   : > { %v639_v42 = vpop.permute.xlu0 %638  ;;  %v990_v47 = vld [vmem:[#allocation3 + $0xc] sm:$0xf] }
 0x397   : > { %642 = vst.msk [vmem:[#allocation3 + $0x8] sm:$0xf] %vm613_vm2, %v639_v42  ;;  %v1134_v49 = vsel %vm994_vm4, %v990_v47, 0  ;;  %v2014_v47 = vld [vmem:[%s2706_s7 + $0x8] sm:$0xff]  }
 0x398   : > { %v2027_v43 = vpop.eup %2026 }
 0x399   : > { %v2029_v44 = vpop.eup %2028  ;;  %v977_v45 = vmul.f32 %v2027_v43, %v2019_v29  ;;  %v1721_v43 = vld [vmem:[%s2708_s9 + $0x5] ss:$0 sm:$0xff] }
 0x39a   : > { %v976_v46 = vmul.f32 %v2029_v44, %v2021_v30 }
 0x39b   : > { %981 = vst.msk [vmem:[%s2534_s24 + $0x10] sm:$0xff] %vm750_vm3, %v977_v45  ;;  %v985_v53 = vpack.c.bf16 %v977_v45, %v977_v45 }
 0x39c   : > { %v984_v48 = vpack.c.bf16 %v976_v46, %v976_v46  ;;  %980 = vst.msk [vmem:[%s2534_s24 + $0x8] sm:$0xff] %vm750_vm3, %v976_v46 }
 0x39e   : > { %1845 = vmatmul.mubr.msk.bf16.vlgmr.msra.gmra.mxu0 %vm750_vm3, %v984_v48  ;;  %v989_v50 = vld [vmem:[#allocation3 + $0x8] sm:$0xf]  ;;  %v2015_v48 = vld [vmem:[%s2706_s7] sm:$0xff]  }
 0x39f   : > { %1855 = vmatpush3.bf16.msra.mxu0 %v1134_v49  ;;  %v1088_v51 = vsel %vm994_vm4, %v989_v50, 0  ;;  %1856 = vmatprep.mubr.msk.bf16.mxu0 %vm2236_vm0, %v2235_v0  ;;  %v1722_v49 = vld [vmem:[#allocation11] ss:$0 sm:$0xff] }
 0x3a0   : > { %v2031_v52 = vpop.eup %2030  ;;  %1849 = vmatpush3.bf16.msra.mxu1 %v1088_v51  ;;  %1868 = vmatprep.subr.bf16.mxu0 %v2235_v0 }
 0x3a1   : > { %v978_v54 = vmul.f32 %v2031_v52, %v2023_v33  ;;  %1860 = vmatprep.subr.bf16.mxu1 %v2235_v0  ;;  %v2009_v33 = vld [vmem:[%s2706_s7 + $0x30] sm:$0xff]  }
 0x3a3   : > { %1851 = vmatmul.mubr.msk.bf16.vlgmr.msra.gmra.mxu1 %vm750_vm3, %v985_v53  ;;  %v986_v55 = vpack.c.bf16 %v978_v54, %v978_v54  ;;  %982 = vst.msk [vmem:[%s2534_s24 + $0x18] sm:$0xff] %vm750_vm3, %v978_v54  ;;  %s2120_s24 = scalar_lea.vmem %s2119_s14, 1024 }
 0x3a4   : > { %1864 = vmatprep.mubr.msk.bf16.mxu1 %vm2236_vm0, %v2235_v0  ;;  %1861 = vmatpush3.bf16.msra.mxu1 %v2004_v60  ;;  %p2122_p6 = scmp.lt.s32.totalorder %s2120_s24, %s2114_s13 }
 0x3a5   : > { %1862 = vmatprep.subr.bf16.mxu1 %v2235_v0 }
 0x3a6   : > { %1857 = vmatmul.mubr.msk.bf16.vlgmr.msra.gmra.mxu0 %vm750_vm3, %v986_v55  ;;  %p2123_p7 = por %p2122_p6, %p2121_p3 }
 0x3a7   : > { %1872 = vmatprep.mubr.msk.bf16.mxu0 %vm2236_vm0, %v2235_v0  ;;  %1869 = vmatpush3.bf16.msra.mxu0 %v2006_v31 }
 0x3a8   : > { %1863 = vmatpush3.bf16.msra.mxu1 %v2005_v61  ;;  %1870 = vmatprep.subr.bf16.mxu0 %v2235_v0  ;;  %p2124_p9 = pnand %p2123_p7, %p2117_p13 }
 0x3a9   : > { %1876 = vmatprep.subr.bf16.mxu1 %v2235_v0 }
 0x3ab   : > { %1871 = vmatpush3.bf16.msra.mxu0 %v2007_v32 }
 0x3f5   : > { %v1032_v56 = vpop.f32.mrf.mxu1 }
 0x3f6   : > { %1176 = vst.msk [vmem:[#allocation5] sm:$0xff] %vm750_vm3, %v1032_v56 }
 0x3f7   : > { %v1840_v57 = vpop.f32.mrf.mxu1 }
 0x3f8   : > { %v1726_v57 = vld [vmem:[%s2708_s9 + $0x6] ss:$0 sm:$0xff] }
 0x3f9   : > { %v1035_v58 = vpop.f32.mrf.mxu1 }
 0x3fb   : > { %v1841_v59 = vpop.f32.mrf.mxu1 }
 0x45e   : > { %v1078_v62 = vpop.f32.mrf.mxu0 }
 0x45f   : > { %1178 = vrot.lane.b32.xlu1 %v1078_v62, %s2713_s16 }
 0x460   : > { %v1846_v63 = vpop.f32.mrf.mxu0 }
 0x462   : > { %v1081_v1 = vpop.f32.mrf.mxu0 }
 0x463   : > { %v1124_v2 = vpop.f32.mrf.mxu1 }
 0x464   : > { %v1847_v3 = vpop.f32.mrf.mxu0  ;;  %1184 = vrot.lane.b32.xlu0 %v1124_v2, %s2241_s21  ;;  %s1747_s21 = sshll.u32 %s2220_s20, 9 }
 0x465   : > { %v1852_v4 = vpop.f32.mrf.mxu1  ;;  %s2626_s12 = scalar_lea.hbm %s2710_s11, %s1747_s21 }
 0x466   : > { %v1170_v5 = vpop.f32.mrf.mxu0 }
 0x467   : > { %1190 = vrot.lane.b32.xlu1 %v1170_v5, %s2242_s30  ;;  %v1127_v6 = vpop.f32.mrf.mxu1 }
 0x468   : > { %v1858_v7 = vpop.f32.mrf.mxu0 }
 0x469   : > { %v1853_v9 = vpop.f32.mrf.mxu1 }
 0x46a   : > { %v1173_v10 = vpop.f32.mrf.mxu0 }
 0x46c   : > { %v1859_v11 = vpop.f32.mrf.mxu0 }
 0x4d1   : > { %v1179_v12 = vpop.permute.xlu1 %1178 }
 0x4d2   : > { %1182 = vst.msk [vmem:[#allocation5] sm:$0xff] %vm1181_vm5, %v1179_v12 }
 0x4d6   : > { %v1185_v13 = vpop.permute.xlu0 %1184 }
 0x4d7   : > { %1188 = vst.msk [vmem:[#allocation5] sm:$0xff] %vm1187_vm6, %v1185_v13 }
 0x4d9   : > { %v1191_v14 = vpop.permute.xlu1 %1190 }
 0x4da   : > { %1194 = vst.msk [vmem:[#allocation5] sm:$0xff] %vm1193_vm7, %v1191_v14 }
 0x4e1   : > { %v1195_v15 = vld [vmem:[#allocation5] sm:$0xff] }
 0x4e2   : > { %v1196_v16 = vpack.c.bf16 %v1195_v15, %v1195_v15 }
 0x4e4   : > { %1865 = vmatmul.mubr.msk.bf16.vlgmr.msra.gmra.mxu1 %vm507_vm1, %v1196_v16 }
 0x4e5   : > { %1892 = vmatprep.mubr.msk.bf16.mxu1 %vm2236_vm0, %v2235_v0 }
 0x5a4   : > { %v1255_v18 = vpop.f32.mrf.mxu1 }
 0x5a5   : > { %v1256_v19 = vadd.f32 %v1716_v17, %v1255_v18 }
 0x5a6   : > { %v1866_v20 = vpop.f32.mrf.mxu1 }
 0x5a7   : > { %v1261_v21 = vadd.f32 %v1256_v19, %v2450_v8  ;;  %v2008_v8 = vld [vmem:[%s2706_s7 + $0x38] sm:$0xff]  }
 0x5a8   : > { %v1258_v23 = vpop.f32.mrf.mxu1  ;;  %1877 = vmatpush3.bf16.msra.mxu1 %v2008_v8 }
 0x5a9   : > { %v1264_v24 = vsel %vm507_vm1, %v1261_v21, 0.0  ;;  %1878 = vmatprep.subr.bf16.mxu1 %v2235_v0 }
 0x5aa   : > { %1265 = vadd.xlane.f32.xlu0 %v1264_v24  ;;  %v1867_v25 = vpop.f32.mrf.mxu1 }
 0x5ac   : > { %1879 = vmatpush3.bf16.msra.mxu1 %v2009_v33 }
 0x5ad   : > { %1880 = vmatprep.subr.bf16.mxu1 %v2235_v0 }
 0x5b0   : > { %1881 = vmatpush3.bf16.msra.mxu1 %v2010_v34 }
 0x5b1   : > { %1882 = vmatprep.subr.bf16.mxu1 %v2235_v0 }
 0x5b4   : > { %1883 = vmatpush3.bf16.msra.mxu1 %v2011_v35 }
 0x5b5   : > { %1884 = vmatprep.subr.bf16.mxu1 %v2235_v0 }
 0x5b8   : > { %1885 = vmatpush3.bf16.msra.mxu1 %v2012_v36 }
 0x5b9   : > { %1886 = vmatprep.subr.bf16.mxu1 %v2235_v0 }
 0x5bc   : > { %1887 = vmatpush3.bf16.msra.mxu1 %v2013_v37 }
 0x5bd   : > { %1888 = vmatprep.subr.bf16.mxu1 %v2235_v0 }
 0x5c0   : > { %1889 = vmatpush3.bf16.msra.mxu1 %v2014_v47 }
 0x5c1   : > { %1890 = vmatprep.subr.bf16.mxu1 %v2235_v0 }
 0x5c4   : > { %1891 = vmatpush3.bf16.msra.mxu1 %v2015_v48 }
 0x633   : > { %v1266_v26 = vpop.xlane.xlu0 %1265 }
 0x634   : > { %v1268_v27 = vmul.f32 0.03125, %v1266_v26 }
 0x636   : > { %v1269_v28 = vsub.f32 %v1261_v21, %v1268_v27 }
 0x638   : > { %v1270_v29 = vmul.f32 %v1269_v28, %v1269_v28 }
 0x63a   : > { %v1271_v30 = vsel %vm507_vm1, %v1270_v29, 0.0 }
 0x63b   : > { %1272 = vadd.xlane.f32.xlu1 %v1271_v30 }
 0x6c4   : > { %v1273_v38 = vpop.xlane.xlu1 %1272 }
 0x6c5   : > { %v1274_v22 = vmul.f32 0.03125, %v1273_v38 }
 0x6c7   : > { %v1275_v39 = vadd.f32 1e-05, %v1274_v22 }
 0x6c9   : > { %2032 = vrsqrt.f32 %v1275_v39 }
 0x6d6   : > { %v2033_v40 = vpop.eup %2032 }
 0x6d7   : > { %v1277_v42 = vmul.f32 %v2033_v40, %v1269_v28 }
 0x6d9   : > { %v1282_v44 = vmul.f32 %v1720_v41, %v1277_v42 }
 0x6db   : > { %v1287_v45 = vadd.f32 %v1721_v43, %v1282_v44 }
 0x6dd   : > { %v1288_v46 = vpack.c.bf16 %v1287_v45, %v1287_v45 }
 0x6df   : > { %1873 = vmatmul.mubr.msk.bf16.vlgmr.msra.gmra.mxu0 %vm507_vm1, %v1288_v46 }
 0x79f   : > { %v1349_v50 = vpop.f32.mrf.mxu0 }
 0x7a0   : > { %v1350_v51 = vadd.f32 %v1722_v49, %v1349_v50 }
 0x7a1   : > { %v1874_v52 = vpop.f32.mrf.mxu0 }
 0x7a2   : > { %v1355_v53 = vmax.f32 %v1350_v51, 0.0 }
 0x7a3   : > { %v1352_v54 = vpop.f32.mrf.mxu0 }
 0x7a4   : > { %v1356_v55 = vpack.c.bf16 %v1355_v53, %v1355_v53 }
 0x7a5   : > { %v1875_v56 = vpop.f32.mrf.mxu0 }
 0x7a6   : > { %1893 = vmatmul.mubr.bf16.vlgmr.msra.gmra.mxu1 %v1356_v55 }
 0x866   : > { %v1460_v0 = vpop.f32.mrf.mxu1 }
 0x867   : > { %v1461_v58 = vadd.f32 %v1726_v57, %v1460_v0 }
 0x868   : > { %v1894_v59 = vpop.f32.mrf.mxu1 }
 0x869   : > { %v1466_v60 = vadd.f32 %v1461_v58, %v1287_v45 }
 0x86a   : > { %v1463_v61 = vpop.f32.mrf.mxu1 }
 0x86b   : > { %v1469_v62 = vsel %vm507_vm1, %v1466_v60, 0.0 }
 0x86c   : > { %1470 = vadd.xlane.f32.xlu0 %v1469_v62  ;;  %v1895_v63 = vpop.f32.mrf.mxu1 }
 0x8f5   : > { %v1471_v1 = vpop.xlane.xlu0 %1470 }
 0x8f6   : > { %v1472_v2 = vmul.f32 0.03125, %v1471_v1 }
 0x8f8   : > { %v1473_v3 = vsub.f32 %v1466_v60, %v1472_v2 }
 0x8fa   : > { %v1474_v4 = vmul.f32 %v1473_v3, %v1473_v3 }
 0x8fc   : > { %v1475_v5 = vsel %vm507_vm1, %v1474_v4, 0.0 }
 0x8fd   : > { %1476 = vadd.xlane.f32.xlu0 %v1475_v5 }
 0x8fe   : > { %2127 = shalt.err (!%p2124_p9)
}
 0x8ff   : > { %s2128_s21 = scalar_lea.hbm %s2626_s12, 512  ;;  %s2132_s28 = scalar_lea.hbm %s2710_s11, 1024 }
 0x900   : > { %p2129_p12 = scmp.ne.s32.totalorder %s2626_s12, %s2128_s21  ;;  %p2133_p2 = scmp.lt.s32.totalorder %s2626_s12, %s2710_s11 }
 0x901   : > { %p2134_p5 = scmp.lt.s32.totalorder %s2132_s28, %s2128_s21 }
 0x902   : > { %p2130_p8 = pnand %p2129_p12, %p2346_p4 }
 0x903   : > { %p2135_p0 = por %p2134_p5, %p2133_p2 }
 0x904   : > { %p2131_p1 = pneg %p2130_p8 }
 0x906   : > { %p2136_p10 = pnand %p2135_p0, %p2131_p1 }
 0x908   : > { %2139 = shalt.err (!%p2136_p10)
}
 0x909   : > { %s2244_s13 = smov 128   ;;  %s2724_s14 = smov 8   ;;  %v1735_v11 = vld [vmem:[%s2708_s9 + $0x7] ss:$0 sm:$0xff]  ;;  %v1736_v13 = vld [vmem:[%s2708_s9 + $0x8] ss:$0 sm:$0xff] }
 0x90a   : > { %s2725_s24 = scalar_lea.sflag [#allocation14], %s2531_s25  ;;  %s1689_s16 = sshll.u32 %s2531_s25, 3 }
 0x90b   : > { %1909 = dma.vmem_to_hbm [thread:$0]  (%p2346_p4), %s2621_s15, 512, %s2626_s12, %s2725_s24, %s2244_s13, %s2244_s13, %s2724_s14  }
 0x90c   : > { %s1739_s28 = sshll.u32 %s2220_s20, 7  ;;  %s460_s0 = scalar_lea.vmem [#allocation12], %s1689_s16 }
 0x90d   : > { %s1513_s15 = sshll.u32 %s460_s0, 4  ;;  %s1511_s14 = scalar_lea.hbm %s2709_s10, %s1739_s28  ;;  %s1514_s15 = int_to_ptr.vmem [resolvable:$true] %s1513_s15 }
 0x90e   : > { %s1494_s24 = scalar_lea.sflag [#allocation8], %s2531_s25  ;;  %s2140_s26 = scalar_lea.vmem %s1514_s15, 128 }
 0x90f   : > { %p2141_p11 = scmp.ne.s32.totalorder %s1514_s15, %s2140_s26  ;;  %s2245_s21 = smov [#allocation12]  }
 0x910   : > { %s2144_s30 = sshll.u32 %s2245_s21, 4  ;;  %s2145_s30 = int_to_ptr.vmem [resolvable:$false] %s2144_s30 }
 0x911   : > { %p2142_p13 = pnand %p2141_p11, %p2346_p4  ;;  %s2146_s20 = scalar_lea.vmem %s2145_s30, 256 }
 0x912   : > { %p2147_p6 = scmp.lt.s32.totalorder %s1514_s15, %s2145_s30  ;;  %p2148_p7 = scmp.lt.s32.totalorder %s2146_s20, %s2140_s26 }
 0x913   : > { %p2143_p3 = pneg %p2142_p13 }
 0x914   : > { %p2149_p9 = por %p2148_p7, %p2147_p6 }
 0x916   : > { %p2150_p12 = pnand %p2149_p9, %p2143_p3 }
 0x986   : > { %v1477_v6 = vpop.xlane.xlu0 %1476 }
 0x987   : > { %v1478_v7 = vmul.f32 0.03125, %v1477_v6 }
 0x989   : > { %v1479_v9 = vadd.f32 1e-05, %v1478_v7 }
 0x98b   : > { %2034 = vrsqrt.f32 %v1479_v9 }
 0x998   : > { %v2035_v10 = vpop.eup %2034 }
 0x999   : > { %v1481_v12 = vmul.f32 %v2035_v10, %v1473_v3 }
 0x99b   : > { %v1486_v14 = vmul.f32 %v1735_v11, %v1481_v12 }
 0x99d   : > { %v1491_v15 = vadd.f32 %v1736_v13, %v1486_v14 }
 0x99f   : > { %1492 = vst.msk [vmem:[%s460_s0] sm:$0xff] %vm507_vm1, %v1491_v15 }
 0x9a0   : > { %2153 = shalt.err (!%p2150_p12)
}
 0x9a1   : > { %s2154_s16 = scalar_lea.hbm %s1511_s14, 128  ;;  %s2158_s23 = scalar_lea.hbm %s2709_s10, 256 }
 0x9a2   : > { %p2155_p8 = scmp.ne.s32.totalorder %s1511_s14, %s2154_s16  ;;  %p2159_p5 = scmp.lt.s32.totalorder %s1511_s14, %s2709_s10 }
 0x9a3   : > { %p2160_p0 = scmp.lt.s32.totalorder %s2158_s23, %s2154_s16 }
 0x9a4   : > { %p2156_p1 = pnand %p2155_p8, %p2346_p4 }
 0x9a5   : > { %p2161_p10 = por %p2160_p0, %p2159_p5 }
 0x9a6   : > { %p2157_p2 = pneg %p2156_p1 }
 0x9a8   : > { %p2162_p11 = pnand %p2161_p10, %p2157_p2 }
 0x9aa   : > { %2165 = shalt.err (!%p2162_p11)
}
 0x9ab   : > { %1908 = dma.vmem_to_hbm [thread:$0]  (%p2346_p4), %s1514_s15, 128, %s1511_s14, %s1494_s24  }
 0x9ac PF: > { %p1935_p13 = scmp.ge.s32.totalorder %s2228_s22, 2  ;;  %s1542_s13 = sand.u32 1, %s2208_s17  }
 0x9ad   : > { %p2726_p3 = scmp.ne.s32.totalorder %s2718_s29, 0  ;;  %s1543_s26 = scalar_lea.sflag [#allocation8], %s1542_s13 }
 0x9af   : > { %p1923_p6 = pnand %p1935_p13, %p2726_p3 }
 0x9b1   : > { %p1924_p7 = pneg %p1923_p6 }
 0x9b3   : > { %2199 = dma.done.wait (%p1924_p7), %s1543_s26, 128  }
 0x9b4   : > { %2201 = vsyncadd (%p1924_p7), %s1543_s26, 4294967168  ;;  %s1552_s21 = scalar_lea.sflag [#allocation14], %s1542_s13 }
 0x9b5   : > { %2203 = dma.done.wait (%p1924_p7), %s1552_s21, 512  }
 0x9b6   : > { %2205 = vsyncadd (%p1924_p7), %s1552_s21, 4294966784  ;;  %s30_s22 = sadd.s32 1, %s2228_s22   ;;  %s2727_s27 = sld [smem:[#allocation21_spill]] }
 0x9b7   : > { %p27_p9 = scmp.ge.s32.totalorder %s30_s22, 4   ;;  %s2728_s20 = sld [smem:[#allocation19_spill]] }
 0x9b8   : > { %s2729_s21 = sld [smem:[#allocation20_spill]]  ;;  %s2730_s17 = smov %s2212_s18 }
 0x9b9   : > { %s2731_s18 = smov %s2216_s19  ;;  %29 = sbr.rel (!%p27_p9) target bundleno = 10 (0xa), region = 141 }
 0x9bc   : > { %s2732_s19 = smov %s2727_s27 }
 0x9be   :  { %1557 = vsyncpa [#allocation7], 1 }
 0x9bf   :  { %1559 = vsyncpa [#allocation7 + $0x1], 1 }
 0x9c0   :  { %1560 = vsyncpa [#allocation10], 1 }
 0x9c1   :  { %1561 = vsyncpa [#allocation8], 1 }
 0x9c2   :  { %1563 = vsyncpa [#allocation8 + $0x1], 1 }
 0x9c3   :  { %1564 = vsyncpa [#allocation14], 1 }
 0x9c4   :  { %1566 = vsyncpa [#allocation14 + $0x1], 1 }

</bundles_post_ra>
